<compile_context>
chip_gen: v7x
topology: tpu7x:2x2x1
jax: 0.10.0
libtpu: 0.0.40
codegen_flags: <defaults>
</compile_context>

<pallas_src>
import functools

import jax
import jax.numpy as jnp
from jax.experimental import pallas as pl
from jax.experimental.pallas import tpu as pltpu

NUM_VULN = 5
H_VULN = 128
H_RISK = 64
H_CONF = 32
H1 = NUM_VULN * H_VULN + H_RISK + H_CONF      # 736
H1P = 768                                     # padded to a multiple of 128
HOUT = 128                                    # lane-dense packed output width
RISK_COL = 2 * NUM_VULN                       # 10
CONF_COL = RISK_COL + 1                       # 11
_MIB = 2 ** 20

VULN_NAMES = [
    "reentrancy",
    "integer_overflow",
    "access_control",
    "timestamp_dependency",
    "unchecked_calls",
]


def _round_up(v, m):
    return ((v + m - 1) // m) * m


def _cdiv(a, b):
    return (a + b - 1) // b


def _tpu_info():
    try:
        return pltpu.get_tpu_info()
    except Exception:
        return None


def _vmem_capacity_bytes():
    info = _tpu_info()
    for attr in ("vmem_capacity_bytes", "vmem_bytes", "vmem_size_bytes"):
        v = getattr(info, attr, None)
        if isinstance(v, int) and v > 0:
            return v
    return 64 * _MIB   # conservative default if the query is unavailable


def _num_tensorcores():
    info = _tpu_info()
    for attr in ("num_cores", "core_count", "num_tensorcores", "tensorcore_count"):
        v = getattr(info, attr, None)
        if isinstance(v, int) and v > 0:
            return v
    try:
        v = getattr(jax.devices()[0], "num_cores", None)
        if isinstance(v, int) and v > 0:
            return v
    except Exception:
        pass
    return 1


def _weight_specs(input_dim, single_buffer):
    """BlockSpecs for weights that never change across the grid.

    With single_buffer=True they are marked pl.Buffered(1): constant index
    maps mean the second pipeline buffer is pure VMEM waste (review item 2).
    """
    def spec(shape):
        idx = lambda *_: (0,) * len(shape)
        if single_buffer:
            return pl.BlockSpec(shape, idx, pipeline_mode=pl.Buffered(1))
        return pl.BlockSpec(shape, idx)
    return [spec((input_dim, H1P)), spec((1, H1P)),
            spec((H1P, HOUT)), spec((1, HOUT))]


def _head_math(pooled, w1, b1, w2, b2):
    """Fused 7-head epilogue on a (TB, D) pooled tile -> (TB, 128) packed."""
    hid = jnp.maximum(
        jnp.dot(pooled, w1, preferred_element_type=jnp.float32) + b1, 0.0)
    out = jnp.dot(hid, w2, preferred_element_type=jnp.float32) + b2
    col = jax.lax.broadcasted_iota(jnp.int32, out.shape, 1)
    sig = (col == RISK_COL) | (col == CONF_COL)
    return jnp.where(sig, jax.nn.sigmoid(out), out)


# ---------------------------------------------------------------------------
# Kernels
# ---------------------------------------------------------------------------
def _fused_kernel(x_ref, w1_ref, b1_ref, w2_ref, b2_ref, out_ref, acc_ref,
                  *, true_s):
    """Single-pass kernel: stream x, accumulate sum, fused heads at the end."""
    s = pl.program_id(1)
    ns = pl.num_programs(1)

    @pl.when(s == 0)
    def _():
        acc_ref[...] = jnp.zeros_like(acc_ref)

    # Running sum over this sequence tile (zero-padded rows contribute 0).
    acc_ref[...] += jnp.sum(x_ref[...].astype(jnp.float32), axis=1)

    @pl.when(s == ns - 1)
    def _():
        pooled = acc_ref[...] * (1.0 / true_s)
        out_ref[...] = _head_math(pooled, w1_ref[...], b1_ref[...],
                                  w2_ref[...], b2_ref[...])


def _partial_sum_kernel(x_ref, part_ref):
    """Phase 1 of the split path: per-chunk pooled-sum accumulation.

    Grid = (chunk, batch_tile, seq_tile); the leading 'parallel' chunk axis
    lets the two v7x TensorCores each stream half of x.
    """
    s = pl.program_id(2)

    @pl.when(s == 0)
    def _():
        part_ref[...] = jnp.zeros_like(part_ref)

    part_ref[...] += jnp.sum(x_ref[...].astype(jnp.float32), axis=1)


def _split_epilogue_kernel(part_ref, w1_ref, b1_ref, w2_ref, b2_ref, out_ref,
                           *, true_s):
    """Phase 2 of the split path: combine partials + fused head matmuls."""
    pooled = jnp.sum(part_ref[...], axis=0) * (1.0 / true_s)
    out_ref[...] = _head_math(pooled, w1_ref[...], b1_ref[...],
                              w2_ref[...], b2_ref[...])


# ---------------------------------------------------------------------------
# Weight packing
# ---------------------------------------------------------------------------
def _pack_weights(params, input_dim):
    """Pack the 7 heads into one (D,768) W1 and one block-diagonal (768,128) W2."""
    vw1, vb1 = params["vw1"], params["vb1"]          # (5,D,128), (5,128)
    vw2, vb2 = params["vw2"], params["vb2"]          # (5,128,2), (5,2)
    rw1, rb1 = params["rw1"], params["rb1"]          # (D,64),    (1,64)
    rw2, rb2 = params["rw2"], params["rb2"]          # (64,1),    (1,1)
    cw1, cb1 = params["cw1"], params["cb1"]          # (D,32),    (1,32)
    cw2, cb2 = params["cw2"], params["cb2"]          # (32,1),    (1,1)

    w1 = jnp.concatenate(
        [vw1.transpose(1, 0, 2).reshape(input_dim, NUM_VULN * H_VULN), rw1, cw1],
        axis=1)
    w1 = jnp.pad(w1, ((0, 0), (0, H1P - H1)))
    b1 = jnp.concatenate(
        [vb1.reshape(1, NUM_VULN * H_VULN),
         rb1.reshape(1, H_RISK),
         cb1.reshape(1, H_CONF)], axis=1)
    b1 = jnp.pad(b1, ((0, 0), (0, H1P - H1)))

    w2 = jnp.zeros((H1P, HOUT), jnp.float32)
    b2 = jnp.zeros((1, HOUT), jnp.float32)
    for h in range(NUM_VULN):
        w2 = w2.at[h * H_VULN:(h + 1) * H_VULN, 2 * h:2 * h + 2].set(vw2[h])
        b2 = b2.at[0, 2 * h:2 * h + 2].set(vb2[h])
    r0 = NUM_VULN * H_VULN
    w2 = w2.at[r0:r0 + H_RISK, RISK_COL:RISK_COL + 1].set(rw2)
    b2 = b2.at[0, RISK_COL].set(rb2[0, 0])
    c0 = r0 + H_RISK
    w2 = w2.at[c0:c0 + H_CONF, CONF_COL:CONF_COL + 1].set(cw2)
    b2 = b2.at[0, CONF_COL].set(cb2[0, 0])
    return w1, b1, w2, b2


# ---------------------------------------------------------------------------
# Wrapper
# ---------------------------------------------------------------------------
def vulnerability_detector(x, params, *, seq_splits=None):
    """x: (B, S, D) float32. Returns (vuln_dict, risk (B,1), confidence (B,1))."""
    B, S, D = x.shape
    w1, b1, w2, b2 = _pack_weights(params, D)

    Dp = _round_up(D, 128)          # lane-padded width (VMEM accounting)
    Dr8 = _round_up(D, 8)           # sublane-padded rows of W1 in VMEM
    vmem_cap = _vmem_capacity_bytes()

    # Resident (single-buffered) weight/bias VMEM footprint.
    wbytes = (Dr8 * H1P + 8 * H1P + H1P * HOUT + 8 * HOUT) * 4

    # Generation-aware streaming budget for the double-buffered x pipeline:
    # ~38 MiB on 128-MiB-VMEM parts (v5e/v6e), ~19 MiB on 64-MiB parts (v7x),
    # and never so large that the resident weights/scratch cannot fit.
    stream_budget = min(int(0.30 * vmem_cap),
                        int(0.60 * vmem_cap) - wbytes
                        - 2 * 64 * max(Dp, HOUT) * 4)
    stream_budget = max(4 * _MIB, stream_budget)

    # ---- tile selection: keep the sequence tile fat; shrink TB first ------
    TB = min(_round_up(B, 8), 64)

    def _ts_cap(tb):
        rows = stream_budget // (2 * tb * Dp * 4)
        return max(8, (rows // 8) * 8)

    while TB > 8 and _ts_cap(TB) < 64:
        TB = max(8, TB // 2)
    TS = min(_round_up(S, 8), _ts_cap(TB))

    Bp = _round_up(B, TB)
    nb = Bp // TB

    # ---- v7x: engage the second TensorCore when the batch grid is 1 -------
    if seq_splits is None:
        ncores = _num_tensorcores()
        seq_splits = min(ncores, 4) if (ncores > 1 and nb == 1 and S >= 16) else 1
    NC = max(1, min(int(seq_splits), 8))

    if NC > 1:
        TS = min(TS, max(8, _round_up(_cdiv(S, NC), 8)))
        Sp = _round_up(S, NC * TS)
        Sc = Sp // NC          # sequence rows per split
        spc = Sc // TS         # sequence blocks per split
    else:
        Sp = _round_up(S, TS)
        spc = Sp // TS

    if (Bp, Sp) != (B, S):
        # Zero-pad: padded S rows add 0 to the sum; padded B rows are sliced off.
        x = jnp.pad(x, ((0, Bp - B), (0, Sp - S), (0, 0)))

    x_pipe = 2 * TB * TS * Dp * 4
    limit_ceiling = 48 * _MIB if vmem_cap <= 64 * _MIB else 100 * _MIB

    def _run(single_buffer):
        w_specs = _weight_specs(D, single_buffer)
        wmult = 1 if single_buffer else 2

        if NC == 1:
            vmem_bytes = (x_pipe + wmult * wbytes
                          + 2 * TB * HOUT * 4 + TB * Dp * 4)
            vmem_limit = int(min(limit_ceiling,
                                 max(32 * _MIB, int(1.5 * vmem_bytes))))
            cost = pl.CostEstimate(
                flops=Bp * Sp * D + 2 * Bp * D * H1P + 2 * Bp * H1P * HOUT,
                transcendentals=Bp * HOUT,
                bytes_accessed=(Bp * Sp * D + D * H1P + H1P * HOUT + 2 * H1P
                                + Bp * HOUT) * 4)
            return pl.pallas_call(
                functools.partial(_fused_kernel, true_s=float(S)),
                out_shape=jax.ShapeDtypeStruct((Bp, HOUT), jnp.float32),
                grid_spec=pltpu.PrefetchScalarGridSpec(
                    num_scalar_prefetch=0,
                    grid=(nb, spc),
                    in_specs=[pl.BlockSpec((TB, TS, D),
                                           lambda b, s: (b, s, 0))] + w_specs,
                    out_specs=pl.BlockSpec((TB, HOUT), lambda b, s: (b, 0)),
                    scratch_shapes=[pltpu.VMEM((TB, D), jnp.float32)]),
                compiler_params=pltpu.CompilerParams(
                    dimension_semantics=("parallel", "arbitrary"),
                    vmem_limit_bytes=vmem_limit),
                cost_estimate=cost,
            )(x, w1, b1, w2, b2)

        # ---- split path: phase 1, per-chunk partial pooled sums ----------
        vmem1 = x_pipe + 2 * TB * Dp * 4
        limit1 = int(min(limit_ceiling, max(32 * _MIB, int(1.5 * vmem1))))
        part = pl.pallas_call(
            _partial_sum_kernel,
            out_shape=jax.ShapeDtypeStruct((NC, Bp, D), jnp.float32),
            grid_spec=pltpu.PrefetchScalarGridSpec(
                num_scalar_prefetch=0,
                grid=(NC, nb, spc),
                in_specs=[pl.BlockSpec(
                    (TB, TS, D), lambda c, b, s: (b, c * spc + s, 0))],
                out_specs=pl.BlockSpec((None, TB, D),
                                       lambda c, b, s: (c, b, 0))),
            compiler_params=pltpu.CompilerParams(
                dimension_semantics=("parallel", "parallel", "arbitrary"),
                vmem_limit_bytes=limit1),
            cost_estimate=pl.CostEstimate(
                flops=Bp * Sp * D, transcendentals=0,
                bytes_accessed=(Bp * Sp * D + NC * Bp * D) * 4),
        )(x)

        # ---- split path: phase 2, combine + fused head matmuls -----------
        vmem2 = (wmult * wbytes + 2 * NC * TB * Dp * 4 + 2 * TB * HOUT * 4)
        limit2 = int(min(limit_ceiling, max(32 * _MIB, int(1.5 * vmem2))))
        return pl.pallas_call(
            functools.partial(_split_epilogue_kernel, true_s=float(S)),
            out_shape=jax.ShapeDtypeStruct((Bp, HOUT), jnp.float32),
            grid_spec=pltpu.PrefetchScalarGridSpec(
                num_scalar_prefetch=0,
                grid=(nb,),
                in_specs=[pl.BlockSpec((NC, TB, D),
                                       lambda b: (0, b, 0))] + w_specs,
                out_specs=pl.BlockSpec((TB, HOUT), lambda b: (b, 0))),
            compiler_params=pltpu.CompilerParams(
                dimension_semantics=("parallel",),
                vmem_limit_bytes=limit2),
            cost_estimate=pl.CostEstimate(
                flops=NC * Bp * D + 2 * Bp * D * H1P + 2 * Bp * H1P * HOUT,
                transcendentals=Bp * HOUT,
                bytes_accessed=(NC * Bp * D + D * H1P + H1P * HOUT + 2 * H1P
                                + Bp * HOUT) * 4),
        )(part, w1, b1, w2, b2)

    try:
        packed = _run(single_buffer=True)
    except Exception:
        # pl.Buffered(1) on the resident-weight BlockSpecs unsupported on this
        # jax build — fall back to the default double-buffered specs.
        packed = _run(single_buffer=False)

    packed = packed[:B]
    vuln_dict = {name: packed[:, 2 * i:2 * i + 2]
                 for i, name in enumerate(VULN_NAMES)}
    risk = packed[:, RISK_COL:RISK_COL + 1]
    conf = packed[:, CONF_COL:CONF_COL + 1]
    return vuln_dict, risk, conf


# ---------------------------------------------------------------------------
# Pure-JAX reference + synthetic params
# ---------------------------------------------------------------------------
def _reference(x, params):
    """Identical math to the PyTorch module in eval mode."""
    pooled = jnp.mean(x, axis=1)
    vuln = {}
    for i, name in enumerate(VULN_NAMES):
        hid = jax.nn.relu(pooled @ params["vw1"][i] + params["vb1"][i])
        vuln[name] = hid @ params["vw2"][i] + params["vb2"][i]
    r_hid = jax.nn.relu(pooled @ params["rw1"] + params["rb1"])
    risk = jax.nn.sigmoid(r_hid @ params["rw2"] + params["rb2"])
    c_hid = jax.nn.relu(pooled @ params["cw1"] + params["cb1"])
    conf = jax.nn.sigmoid(c_hid @ params["cw2"] + params["cb2"])
    return vuln, risk, conf


def init_params(key, input_dim):
    """Deterministic synthetic init (PyTorch-Linear-style uniform bounds)."""
    def lin(k, fan_in, fan_out):
        bound = 1.0 / (fan_in ** 0.5)
        kw, kb = jax.random.split(k)
        w = jax.random.uniform(kw, (fan_in, fan_out), jnp.float32, -bound, bound)
        b = jax.random.uniform(kb, (fan_out,), jnp.float32, -bound, bound)
        return w, b

    keys = list(jax.random.split(key, 2 * NUM_VULN + 4))
    ki = iter(keys)

    vw1, vb1, vw2, vb2 = [], [], [], []
    for _ in range(NUM_VULN):
        w1, b1 = lin(next(ki), input_dim, H_VULN)
        w2, b2 = lin(next(ki), H_VULN, 2)
        vw1.append(w1); vb1.append(b1); vw2.append(w2); vb2.append(b2)

    rw1, rb1 = lin(next(ki), input_dim, H_RISK)
    rw2, rb2 = lin(next(ki), H_RISK, 1)
    cw1, cb1 = lin(next(ki), input_dim, H_CONF)
    cw2, cb2 = lin(next(ki), H_CONF, 1)

    return {
        "vw1": jnp.stack(vw1),                    # (5, D, 128)
        "vb1": jnp.stack(vb1),                    # (5, 128)
        "vw2": jnp.stack(vw2),                    # (5, 128, 2)
        "vb2": jnp.stack(vb2),                    # (5, 2)
        "rw1": rw1, "rb1": rb1.reshape(1, H_RISK),
        "rw2": rw2, "rb2": rb2.reshape(1, 1),
        "cw1": cw1, "cb1": cb1.reshape(1, H_CONF),
        "cw2": cw2, "cb2": cb2.reshape(1, 1),
    }


if __name__ == "__main__":
    key = jax.random.PRNGKey(0)
    kx, kp, kx2, kx3 = jax.random.split(key, 4)

    B, S, D = 2, 8, 32
    x = jax.random.normal(kx, (B, S, D), jnp.float32)
    params = init_params(kp, D)

    vuln_dict, risk, conf = vulnerability_detector(x, params)
    jax.block_until_ready((vuln_dict, risk, conf))

    assert set(vuln_dict.keys()) == set(VULN_NAMES)
    for name in VULN_NAMES:
        assert vuln_dict[name].shape == (B, 2)
    assert risk.shape == (B, 1) and conf.shape == (B, 1)

    ref_vuln, ref_risk, ref_conf = _reference(x, params)
    for name in VULN_NAMES:
        assert jnp.allclose(vuln_dict[name], ref_vuln[name], atol=1e-4, rtol=1e-4)
    assert jnp.allclose(risk, ref_risk, atol=1e-4, rtol=1e-4)
    assert jnp.allclose(conf, ref_conf, atol=1e-4, rtol=1e-4)

    # Second shape: exercises grid tiling + batch/sequence padding paths.
    B2, S2 = 3, 40
    x2 = jax.random.normal(kx2, (B2, S2, D), jnp.float32)
    v2, r2, c2 = vulnerability_detector(x2, params)
    jax.block_until_ready((v2, r2, c2))
    rv2, rr2, rc2 = _reference(x2, params)
    for name in VULN_NAMES:
        assert jnp.allclose(v2[name], rv2[name], atol=1e-4, rtol=1e-4)
    assert jnp.allclose(r2, rr2, atol=1e-4, rtol=1e-4)
    assert jnp.allclose(c2, rc2, atol=1e-4, rtol=1e-4)

    # Third shape: force the v7x 2-TensorCore sequence-split path (correct on
    # any chip; the leading 'parallel' axis just runs serially on 1-TC parts).
    B3, S3 = 2, 48
    x3 = jax.random.normal(kx3, (B3, S3, D), jnp.float32)
    v3, r3, c3 = vulnerability_detector(x3, params, seq_splits=2)
    jax.block_until_ready((v3, r3, c3))
    rv3, rr3, rc3 = _reference(x3, params)
    for name in VULN_NAMES:
        assert jnp.allclose(v3[name], rv3[name], atol=1e-4, rtol=1e-4)
    assert jnp.allclose(r3, rr3, atol=1e-4, rtol=1e-4)
    assert jnp.allclose(c3, rc3, atol=1e-4, rtol=1e-4)

    print("KERNEL_OK")
</pallas_src>

<mosaic_0001>
module attributes {stable_mosaic.version = 11 : i64} {
  func.func @_fused_kernel(%arg0: i32, %arg1: i32, %arg2: memref<8x8x32xf32, #tpu.memory_space<vmem>>, %arg3: memref<32x768xf32, #tpu.memory_space<vmem>>, %arg4: memref<1x768xf32, #tpu.memory_space<vmem>>, %arg5: memref<768x128xf32, #tpu.memory_space<vmem>>, %arg6: memref<1x128xf32, #tpu.memory_space<vmem>>, %arg7: memref<8x128xf32, #tpu.memory_space<vmem>>, %arg8: memref<8x32xf32, #tpu.memory_space<vmem>>) attributes {dimension_semantics = [#tpu.dimension_semantics<parallel>, #tpu.dimension_semantics<arbitrary>], iteration_bounds = array<i64: 1, 1>, scalar_prefetch = 0 : i64, scratch_operands = 1 : i64, tpu.core_type = #tpu.core_type<tc>, window_params = [{transform_indices = @transform_0, window_bounds = array<i64: 8, 8, 32>}, {pipeline_mode = #tpu.pipeline_mode<synchronous>, transform_indices = @transform_1, window_bounds = array<i64: 32, 768>}, {pipeline_mode = #tpu.pipeline_mode<synchronous>, transform_indices = @transform_2, window_bounds = array<i64: 1, 768>}, {pipeline_mode = #tpu.pipeline_mode<synchronous>, transform_indices = @transform_3, window_bounds = array<i64: 768, 128>}, {pipeline_mode = #tpu.pipeline_mode<synchronous>, transform_indices = @transform_4, window_bounds = array<i64: 1, 128>}, {transform_indices = @transform_5, window_bounds = array<i64: 8, 128>}]} {
    %c0_i32 = arith.constant 0 : i32
    %0 = arith.cmpi eq, %arg1, %c0_i32 : i32
    %1 = arith.extui %0 : i1 to i32
    %c0_i32_0 = arith.constant 0 : i32
    %2 = arith.cmpi ne, %1, %c0_i32_0 : i32
    scf.if %2 {
      %cst_9 = arith.constant 0.000000e+00 : f32
      %11 = vector.broadcast %cst_9 : f32 to vector<8x32xf32>
      %c0_10 = arith.constant 0 : index
      %c0_11 = arith.constant 0 : index
      %12 = vector.load %arg8[%c0_10, %c0_11] : memref<8x32xf32, #tpu.memory_space<vmem>>, vector<8x32xf32>
      tpu.vector_store %arg8[%c0_10, %c0_11], %11 {strides = array<i32>} : memref<8x32xf32, #tpu.memory_space<vmem>>, vector<8x32xf32>,
    } else {
    }
    %c0 = arith.constant 0 : index
    %c0_1 = arith.constant 0 : index
    %3 = vector.load %arg8[%c0, %c0_1] : memref<8x32xf32, #tpu.memory_space<vmem>>, vector<8x32xf32>
    %c0_2 = arith.constant 0 : index
    %c0_3 = arith.constant 0 : index
    %c0_4 = arith.constant 0 : index
    %4 = vector.load %arg2[%c0_2, %c0_3, %c0_4] : memref<8x8x32xf32, #tpu.memory_space<vmem>>, vector<8x8x32xf32>
    %cst = arith.constant dense<0.000000e+00> : vector<8x32xf32>
    %5 = vector.multi_reduction <add>, %4, %cst [1] : vector<8x8x32xf32> to vector<8x32xf32>
    %6 = arith.addf %3, %5 : vector<8x32xf32>
    %c0_5 = arith.constant 0 : index
    %c0_6 = arith.constant 0 : index
    %7 = vector.load %arg8[%c0_5, %c0_6] : memref<8x32xf32, #tpu.memory_space<vmem>>, vector<8x32xf32>
    tpu.vector_store %arg8[%c0_5, %c0_6], %6 {strides = array<i32>} : memref<8x32xf32, #tpu.memory_space<vmem>>, vector<8x32xf32>,
    %c0_i32_7 = arith.constant 0 : i32
    %8 = arith.cmpi eq, %arg1, %c0_i32_7 : i32
    %9 = arith.extui %8 : i1 to i32
    %c0_i32_8 = arith.constant 0 : i32
    %10 = arith.cmpi ne, %9, %c0_i32_8 : i32
    scf.if %10 {
      %c0_9 = arith.constant 0 : index
      %c0_10 = arith.constant 0 : index
      %11 = vector.load %arg8[%c0_9, %c0_10] : memref<8x32xf32, #tpu.memory_space<vmem>>, vector<8x32xf32>
      %cst_11 = arith.constant 1.250000e-01 : f32
      %12 = vector.broadcast %cst_11 : f32 to vector<8x32xf32>
      %13 = arith.mulf %11, %12 : vector<8x32xf32>
      %c0_12 = arith.constant 0 : index
      %c0_13 = arith.constant 0 : index
      %14 = vector.load %arg3[%c0_12, %c0_13] : memref<32x768xf32, #tpu.memory_space<vmem>>, vector<32x768xf32>
      %c0_14 = arith.constant 0 : index
      %c0_15 = arith.constant 0 : index
      %15 = vector.load %arg4[%c0_14, %c0_15] : memref<1x768xf32, #tpu.memory_space<vmem>>, vector<1x768xf32>
      %c0_16 = arith.constant 0 : index
      %c0_17 = arith.constant 0 : index
      %16 = vector.load %arg5[%c0_16, %c0_17] : memref<768x128xf32, #tpu.memory_space<vmem>>, vector<768x128xf32>
      %c0_18 = arith.constant 0 : index
      %c0_19 = arith.constant 0 : index
      %17 = vector.load %arg6[%c0_18, %c0_19] : memref<1x128xf32, #tpu.memory_space<vmem>>, vector<1x128xf32>
      %cst_20 = arith.constant dense<0.000000e+00> : vector<8x768xf32>
      %18 = tpu.matmul %13, %14, %cst_20 {dimension_numbers = #tpu.dot_dimension_numbers<[1], [0], [0], [1], [0, 0, 1, 1], [], []>} : vector<8x32xf32>, vector<32x768xf32>, vector<8x768xf32> -> vector<8x768xf32>
      %19 = vector.broadcast %15 : vector<1x768xf32> to vector<8x768xf32>
      %20 = arith.addf %18, %19 : vector<8x768xf32>
      %cst_21 = arith.constant 0.000000e+00 : f32
      %21 = vector.broadcast %cst_21 : f32 to vector<8x768xf32>
      %22 = arith.maximumf %20, %21 : vector<8x768xf32>
      %cst_22 = arith.constant dense<0.000000e+00> : vector<8x128xf32>
      %23 = tpu.matmul %22, %16, %cst_22 {dimension_numbers = #tpu.dot_dimension_numbers<[1], [0], [0], [1], [0, 0, 1, 1], [], []>} : vector<8x768xf32>, vector<768x128xf32>, vector<8x128xf32> -> vector<8x128xf32>
      %24 = vector.broadcast %17 : vector<1x128xf32> to vector<8x128xf32>
      %25 = arith.addf %23, %24 : vector<8x128xf32>
      %26 = tpu.iota {dimensions = array<i32: 1>} : vector<8x128xi32>
      %c10_i32 = arith.constant 10 : i32
      %27 = vector.broadcast %c10_i32 : i32 to vector<8x128xi32>
      %28 = arith.cmpi eq, %26, %27 : vector<8x128xi32>
      %c11_i32 = arith.constant 11 : i32
      %29 = vector.broadcast %c11_i32 : i32 to vector<8x128xi32>
      %30 = arith.cmpi eq, %26, %29 : vector<8x128xi32>
      %31 = arith.ori %28, %30 : vector<8x128xi1>
      %32 = arith.negf %25 : vector<8x128xf32>
      %33 = math.exp %32 : vector<8x128xf32>
      %cst_23 = arith.constant 1.000000e+00 : f32
      %34 = vector.broadcast %cst_23 : f32 to vector<8x128xf32>
      %35 = arith.addf %34, %33 : vector<8x128xf32>
      %36 = arith.divf %34, %35 : vector<8x128xf32>
      %37 = arith.select %31, %36, %25 : vector<8x128xi1>, vector<8x128xf32>
      %c0_24 = arith.constant 0 : index
      %c0_25 = arith.constant 0 : index
      %38 = vector.load %arg7[%c0_24, %c0_25] : memref<8x128xf32, #tpu.memory_space<vmem>>, vector<8x128xf32>
      tpu.vector_store %arg7[%c0_24, %c0_25], %37 {strides = array<i32>} : memref<8x128xf32, #tpu.memory_space<vmem>>, vector<8x128xf32>,
    } else {
    }
    return
  }
  func.func @transform_0(%arg0: i32, %arg1: i32) -> (i32, i32, i32) {
    %c0_i32 = arith.constant 0 : i32
    %c0_i32_0 = arith.constant 0 : i32
    return %arg0, %arg1, %c0_i32 : i32, i32, i32
  }
  func.func @transform_1(%arg0: i32, %arg1: i32) -> (i32, i32) {
    %c0_i32 = arith.constant 0 : i32
    %c0_i32_0 = arith.constant 0 : i32
    %c0_i32_1 = arith.constant 0 : i32
    return %c0_i32, %c0_i32_0 : i32, i32
  }
  func.func @transform_2(%arg0: i32, %arg1: i32) -> (i32, i32) {
    %c0_i32 = arith.constant 0 : i32
    %c0_i32_0 = arith.constant 0 : i32
    %c0_i32_1 = arith.constant 0 : i32
    return %c0_i32, %c0_i32_0 : i32, i32
  }
  func.func @transform_3(%arg0: i32, %arg1: i32) -> (i32, i32) {
    %c0_i32 = arith.constant 0 : i32
    %c0_i32_0 = arith.constant 0 : i32
    %c0_i32_1 = arith.constant 0 : i32
    return %c0_i32, %c0_i32_0 : i32, i32
  }
  func.func @transform_4(%arg0: i32, %arg1: i32) -> (i32, i32) {
    %c0_i32 = arith.constant 0 : i32
    %c0_i32_0 = arith.constant 0 : i32
    %c0_i32_1 = arith.constant 0 : i32
    return %c0_i32, %c0_i32_0 : i32, i32
  }
  func.func @transform_5(%arg0: i32, %arg1: i32) -> (i32, i32) {
    %c0_i32 = arith.constant 0 : i32
    %c0_i32_0 = arith.constant 0 : i32
    return %arg0, %c0_i32 : i32, i32
  }
}

module attributes {stable_mosaic.version = 11 : i64} {
  func.func @_fused_kernel(%arg0: i32, %arg1: i32, %arg2: memref<8x8x32xf32, #tpu.memory_space<vmem>>, %arg3: memref<32x768xf32, #tpu.memory_space<vmem>>, %arg4: memref<1x768xf32, #tpu.memory_space<vmem>>, %arg5: memref<768x128xf32, #tpu.memory_space<vmem>>, %arg6: memref<1x128xf32, #tpu.memory_space<vmem>>, %arg7: memref<8x128xf32, #tpu.memory_space<vmem>>, %arg8: memref<8x32xf32, #tpu.memory_space<vmem>>) attributes {dimension_semantics = [#tpu.dimension_semantics<parallel>, #tpu.dimension_semantics<arbitrary>], iteration_bounds = array<i64: 1, 1>, scalar_prefetch = 0 : i64, scratch_operands = 1 : i64, tpu.core_type = #tpu.core_type<tc>, window_params = [{transform_indices = @transform_0, window_bounds = array<i64: 8, 8, 32>}, {pipeline_mode = #tpu.pipeline_mode<synchronous>, transform_indices = @transform_1, window_bounds = array<i64: 32, 768>}, {pipeline_mode = #tpu.pipeline_mode<synchronous>, transform_indices = @transform_2, window_bounds = array<i64: 1, 768>}, {pipeline_mode = #tpu.pipeline_mode<synchronous>, transform_indices = @transform_3, window_bounds = array<i64: 768, 128>}, {pipeline_mode = #tpu.pipeline_mode<synchronous>, transform_indices = @transform_4, window_bounds = array<i64: 1, 128>}, {transform_indices = @transform_5, window_bounds = array<i64: 8, 128>}]} {
    %c0_i32 = arith.constant 0 : i32
    %0 = arith.cmpi eq, %arg1, %c0_i32 : i32
    %1 = arith.extui %0 : i1 to i32
    %c0_i32_0 = arith.constant 0 : i32
    %2 = arith.cmpi ne, %1, %c0_i32_0 : i32
    scf.if %2 {
      %cst_9 = arith.constant 0.000000e+00 : f32
      %11 = vector.broadcast %cst_9 : f32 to vector<8x32xf32>
      %c0_10 = arith.constant 0 : index
      %c0_11 = arith.constant 0 : index
      %12 = vector.load %arg8[%c0_10, %c0_11] : memref<8x32xf32, #tpu.memory_space<vmem>>, vector<8x32xf32>
      tpu.vector_store %arg8[%c0_10, %c0_11], %11 {strides = array<i32>} : memref<8x32xf32, #tpu.memory_space<vmem>>, vector<8x32xf32>,
    } else {
    }
    %c0 = arith.constant 0 : index
    %c0_1 = arith.constant 0 : index
    %3 = vector.load %arg8[%c0, %c0_1] : memref<8x32xf32, #tpu.memory_space<vmem>>, vector<8x32xf32>
    %c0_2 = arith.constant 0 : index
    %c0_3 = arith.constant 0 : index
    %c0_4 = arith.constant 0 : index
    %4 = vector.load %arg2[%c0_2, %c0_3, %c0_4] : memref<8x8x32xf32, #tpu.memory_space<vmem>>, vector<8x8x32xf32>
    %cst = arith.constant dense<0.000000e+00> : vector<8x32xf32>
    %5 = vector.multi_reduction <add>, %4, %cst [1] : vector<8x8x32xf32> to vector<8x32xf32>
    %6 = arith.addf %3, %5 : vector<8x32xf32>
    %c0_5 = arith.constant 0 : index
    %c0_6 = arith.constant 0 : index
    %7 = vector.load %arg8[%c0_5, %c0_6] : memref<8x32xf32, #tpu.memory_space<vmem>>, vector<8x32xf32>
    tpu.vector_store %arg8[%c0_5, %c0_6], %6 {strides = array<i32>} : memref<8x32xf32, #tpu.memory_space<vmem>>, vector<8x32xf32>,
    %c0_i32_7 = arith.constant 0 : i32
    %8 = arith.cmpi eq, %arg1, %c0_i32_7 : i32
    %9 = arith.extui %8 : i1 to i32
    %c0_i32_8 = arith.constant 0 : i32
    %10 = arith.cmpi ne, %9, %c0_i32_8 : i32
    scf.if %10 {
      %c0_9 = arith.constant 0 : index
      %c0_10 = arith.constant 0 : index
      %11 = vector.load %arg8[%c0_9, %c0_10] : memref<8x32xf32, #tpu.memory_space<vmem>>, vector<8x32xf32>
      %cst_11 = arith.constant 1.250000e-01 : f32
      %12 = vector.broadcast %cst_11 : f32 to vector<8x32xf32>
      %13 = arith.mulf %11, %12 : vector<8x32xf32>
      %c0_12 = arith.constant 0 : index
      %c0_13 = arith.constant 0 : index
      %14 = vector.load %arg3[%c0_12, %c0_13] : memref<32x768xf32, #tpu.memory_space<vmem>>, vector<32x768xf32>
      %c0_14 = arith.constant 0 : index
      %c0_15 = arith.constant 0 : index
      %15 = vector.load %arg4[%c0_14, %c0_15] : memref<1x768xf32, #tpu.memory_space<vmem>>, vector<1x768xf32>
      %c0_16 = arith.constant 0 : index
      %c0_17 = arith.constant 0 : index
      %16 = vector.load %arg5[%c0_16, %c0_17] : memref<768x128xf32, #tpu.memory_space<vmem>>, vector<768x128xf32>
      %c0_18 = arith.constant 0 : index
      %c0_19 = arith.constant 0 : index
      %17 = vector.load %arg6[%c0_18, %c0_19] : memref<1x128xf32, #tpu.memory_space<vmem>>, vector<1x128xf32>
      %cst_20 = arith.constant dense<0.000000e+00> : vector<8x768xf32>
      %18 = tpu.matmul %13, %14, %cst_20 {dimension_numbers = #tpu.dot_dimension_numbers<[1], [0], [0], [1], [0, 0, 1, 1], [], []>} : vector<8x32xf32>, vector<32x768xf32>, vector<8x768xf32> -> vector<8x768xf32>
      %19 = vector.broadcast %15 : vector<1x768xf32> to vector<8x768xf32>
      %20 = arith.addf %18, %19 : vector<8x768xf32>
      %cst_21 = arith.constant 0.000000e+00 : f32
      %21 = vector.broadcast %cst_21 : f32 to vector<8x768xf32>
      %22 = arith.maximumf %20, %21 : vector<8x768xf32>
      %cst_22 = arith.constant dense<0.000000e+00> : vector<8x128xf32>
      %23 = tpu.matmul %22, %16, %cst_22 {dimension_numbers = #tpu.dot_dimension_numbers<[1], [0], [0], [1], [0, 0, 1, 1], [], []>} : vector<8x768xf32>, vector<768x128xf32>, vector<8x128xf32> -> vector<8x128xf32>
      %24 = vector.broadcast %17 : vector<1x128xf32> to vector<8x128xf32>
      %25 = arith.addf %23, %24 : vector<8x128xf32>
      %26 = tpu.iota {dimensions = array<i32: 1>} : vector<8x128xi32>
      %c10_i32 = arith.constant 10 : i32
      %27 = vector.broadcast %c10_i32 : i32 to vector<8x128xi32>
      %28 = arith.cmpi eq, %26, %27 : vector<8x128xi32>
      %c11_i32 = arith.constant 11 : i32
      %29 = vector.broadcast %c11_i32 : i32 to vector<8x128xi32>
      %30 = arith.cmpi eq, %26, %29 : vector<8x128xi32>
      %31 = arith.ori %28, %30 : vector<8x128xi1>
      %32 = arith.negf %25 : vector<8x128xf32>
      %33 = math.exp %32 : vector<8x128xf32>
      %cst_23 = arith.constant 1.000000e+00 : f32
      %34 = vector.broadcast %cst_23 : f32 to vector<8x128xf32>
      %35 = arith.addf %34, %33 : vector<8x128xf32>
      %36 = arith.divf %34, %35 : vector<8x128xf32>
      %37 = arith.select %31, %36, %25 : vector<8x128xi1>, vector<8x128xf32>
      %c0_24 = arith.constant 0 : index
      %c0_25 = arith.constant 0 : index
      %38 = vector.load %arg7[%c0_24, %c0_25] : memref<8x128xf32, #tpu.memory_space<vmem>>, vector<8x128xf32>
      tpu.vector_store %arg7[%c0_24, %c0_25], %37 {strides = array<i32>} : memref<8x128xf32, #tpu.memory_space<vmem>>, vector<8x128xf32>,
    } else {
    }
    return
  }
  func.func @transform_0(%arg0: i32, %arg1: i32) -> (i32, i32, i32) {
    %c0_i32 = arith.constant 0 : i32
    %c0_i32_0 = arith.constant 0 : i32
    return %arg0, %arg1, %c0_i32 : i32, i32, i32
  }
  func.func @transform_1(%arg0: i32, %arg1: i32) -> (i32, i32) {
    %c0_i32 = arith.constant 0 : i32
    %c0_i32_0 = arith.constant 0 : i32
    %c0_i32_1 = arith.constant 0 : i32
    return %c0_i32, %c0_i32_0 : i32, i32
  }
  func.func @transform_2(%arg0: i32, %arg1: i32) -> (i32, i32) {
    %c0_i32 = arith.constant 0 : i32
    %c0_i32_0 = arith.constant 0 : i32
    %c0_i32_1 = arith.constant 0 : i32
    return %c0_i32, %c0_i32_0 : i32, i32
  }
  func.func @transform_3(%arg0: i32, %arg1: i32) -> (i32, i32) {
    %c0_i32 = arith.constant 0 : i32
    %c0_i32_0 = arith.constant 0 : i32
    %c0_i32_1 = arith.constant 0 : i32
    return %c0_i32, %c0_i32_0 : i32, i32
  }
  func.func @transform_4(%arg0: i32, %arg1: i32) -> (i32, i32) {
    %c0_i32 = arith.constant 0 : i32
    %c0_i32_0 = arith.constant 0 : i32
    %c0_i32_1 = arith.constant 0 : i32
    return %c0_i32, %c0_i32_0 : i32, i32
  }
  func.func @transform_5(%arg0: i32, %arg1: i32) -> (i32, i32) {
    %c0_i32 = arith.constant 0 : i32
    %c0_i32_0 = arith.constant 0 : i32
    return %arg0, %c0_i32 : i32, i32
  }
}

</mosaic_0001>

<bundles_post_ra>
// kernel: tpu_custom_call.1
= control target key start
LH: loop header
LB: loop body
LE: loop exit
PB: predicated region body
PF: predicated region fallthrough
CT: control target
= control target key end

     0   :  { %10 = vsyncpa [#allocation4], 0  ;;  %s1254_s0 = inlined_call_operand.hbm [shape: f32[8,8,32], index: 0, kind: input, shape index: {}]   ;;  %s1255_s1 = inlined_call_operand.hbm [shape: f32[32,768], index: 1, kind: input, shape index: {}]   ;;  %s1256_s2 = inlined_call_operand.vmem [shape: f32[1,768], index: 2, kind: input, shape index: {}]   ;;  %s1257_s3 = inlined_call_operand.hbm [shape: f32[768,128], index: 3, kind: input, shape index: {}]   ;;  %s1258_s4 = inlined_call_operand.vmem [shape: f32[1,128], index: 4, kind: input, shape index: {}]   ;;  %s1259_s5 = inlined_call_operand.hbm [shape: f32[8,128], index: 5, kind: output, shape index: {}]  }
   0x1   :  { %11 = vsyncpa [#allocation7], 0 }
   0x2   :  { %12 = vsyncpa [#allocation5], 0  ;;  %s1121_s18 = smov [#allocation6]   ;;  %s1027_s22 = scalar_lea.hbm %s1255_s1, 3072 }
   0x3   :  { %s30_s19 = sshll.u32 %s1121_s18, 4  ;;  %p1028_p0 = scmp.ne.s32.totalorder %s1255_s1, %s1027_s22  ;;  %s31_s19 = int_to_ptr.vmem [resolvable:$true] %s30_s19 }
   0x4   :  { %p1031_p1 = scmp.lt.u32.totalorder %s1027_s22, %s1255_s1 }
   0x6   :  { %p1033_p2 = pnand %p1031_p1, %p1028_p0 }
   0x8   :  { %1036 = shalt.err (!%p1033_p2)
}
   0x9   :  { %s1037_s27 = scalar_lea.vmem %s31_s19, 3072  ;;  %p1042_p4 = scmp.lt.s32.totalorder %s31_s19, %s31_s19 }
   0xa   :  { %p1038_p3 = scmp.ne.s32.totalorder %s31_s19, %s1037_s27  ;;  %p1043_p5 = scmp.lt.s32.totalorder %s1037_s27, %s1037_s27 }
   0xc   :  { %p1044_p6 = por %p1043_p5, %p1042_p4 }
   0xe   :  { %p1045_p7 = pnand %p1044_p6, %p1038_p3 }
  0x10   :  { %1048 = shalt.err (!%p1045_p7)
}
  0x11   :  { %s1122_s28 = smov 768   ;;  %s1123_s29 = smov 48  }
  0x12   :  { %36 = dma.hbm_to_vmem [thread:$0]  %s1255_s1, 3072, %s31_s19, [#allocation7], %s1122_s28, %s1122_s28, %s1123_s29  }
  0x13   :  { %s1124_s7 = smov [#allocation3]   ;;  %s1049_s11 = scalar_lea.hbm %s1254_s0, 1024 }
  0x14   :  { %s18_s8 = sshll.u32 %s1124_s7, 4  ;;  %p1050_p8 = scmp.ne.s32.totalorder %s1254_s0, %s1049_s11  ;;  %s19_s8 = int_to_ptr.vmem [resolvable:$true] %s18_s8 }
  0x15   :  { %p1053_p9 = scmp.lt.u32.totalorder %s1049_s11, %s1254_s0 }
  0x17   :  { %p1055_p10 = pnand %p1053_p9, %p1050_p8 }
  0x19   :  { %1058 = shalt.err (!%p1055_p10)
}
  0x1a   :  { %s1059_s16 = scalar_lea.vmem %s19_s8, 1024  ;;  %p1064_p12 = scmp.lt.s32.totalorder %s19_s8, %s19_s8 }
  0x1b   :  { %p1060_p11 = scmp.ne.s32.totalorder %s19_s8, %s1059_s16  ;;  %p1065_p13 = scmp.lt.s32.totalorder %s1059_s16, %s1059_s16 }
  0x1d   :  { %p1066_p0 = por %p1065_p13, %p1064_p12 }
  0x1f   :  { %p1067_p1 = pnand %p1066_p0, %p1060_p11 }
  0x21   :  { %1070 = shalt.err (!%p1067_p1)
}
  0x22   :  { %s1125_s1 = smov 128   ;;  %s1126_s17 = smov 8  }
  0x23   :  { %24 = dma.hbm_to_vmem [thread:$0]  %s1254_s0, 1024, %s19_s8, [#allocation4], %s1125_s1, %s1125_s1, %s1126_s17  }
  0x24   :  { %s1127_s20 = smov [#allocation8]   ;;  %s1071_s24 = scalar_lea.hbm %s1257_s3, 12288 }
  0x25   :  { %s44_s21 = sshll.u32 %s1127_s20, 4  ;;  %p1072_p2 = scmp.ne.s32.totalorder %s1257_s3, %s1071_s24  ;;  %s45_s21 = int_to_ptr.vmem [resolvable:$true] %s44_s21 }
  0x26   :  { %p1075_p3 = scmp.lt.u32.totalorder %s1071_s24, %s1257_s3 }
  0x28   :  { %p1077_p4 = pnand %p1075_p3, %p1072_p2 }
  0x2a   :  { %1080 = shalt.err (!%p1077_p4)
}
  0x2b   :  { %s1081_s29 = scalar_lea.vmem %s45_s21, 12288  ;;  %p1086_p6 = scmp.lt.s32.totalorder %s45_s21, %s45_s21 }
  0x2c   :  { %p1082_p5 = scmp.ne.s32.totalorder %s45_s21, %s1081_s29  ;;  %p1087_p7 = scmp.lt.s32.totalorder %s1081_s29, %s1081_s29 }
  0x2e   :  { %p1088_p8 = por %p1087_p7, %p1086_p6 }
  0x30   :  { %p1089_p9 = pnand %p1088_p8, %p1082_p5 }
  0x32   :  { %1092 = shalt.err (!%p1089_p9)
}
  0x33   :  { %50 = dma.hbm_to_vmem [thread:$0]  %s1257_s3, 12288, %s45_s21, [#allocation7], %s1125_s1, %s1125_s1, %s1126_s17  }
  0x34   :  { %1115 = dma.done.wait [#allocation4], 1024  }
  0x35   :  { %1116 = vsyncadd [#allocation4], 4294966272 }
  0x36   :  { %1117 = dma.done.wait [#allocation7], 15360  }
  0x37   :  { %1118 = vsyncadd [#allocation7], 4294951936  ;;  %vm66_vm0 = vcmask 261120   ;;  %v1128_v0 = vmov 0.0   ;;  %v165_v1 = vld [vmem:[#allocation6 + $0x8] sm:$0xff]  ;;  %v171_v2 = vld [vmem:[#allocation6 + $0x38] sm:$0xff] }
  0x38   :  { %67 = vst.msk [vmem:[#allocation2] sm:$0xff] %vm66_vm0, %v1128_v0  ;;  %384 = vmatprep.mubr.f32.mxu0 %v1128_v0  ;;  %v164_v3 = vld [vmem:[#allocation6] sm:$0xff]  ;;  %v894_v4 = vpack.c.bf16 %v171_v2, %v165_v1  ;;  %v170_v5 = vld [vmem:[#allocation6 + $0x30] sm:$0xff]  ;;  %v177_v6 = vld [vmem:[#allocation6 + $0x68] sm:$0xff]  ;;  %vm142_vm1 = vcmask 1041409   ;;  %vm144_vm2 = vcmask 1042434  }
  0x39   :  { %v183_v7 = vld [vmem:[#allocation6 + $0x98] sm:$0xff]  ;;  %v896_v8 = vpack.c.bf16 %v170_v5, %v164_v3  ;;  %v176_v10 = vld [vmem:[#allocation6 + $0x60] sm:$0xff]  ;;  %v182_v11 = vld [vmem:[#allocation6 + $0x90] sm:$0xff]  ;;  %vm146_vm3 = vcmask 1043459   ;;  %vm148_vm4 = vcmask 1044484   ;;  %vm150_vm5 = vcmask 1045509  }
  0x3a   :  { %v898_v9 = vpack.c.bf16 %v183_v7, %v177_v6  ;;  %895 = vmatprep.subr.bf16.mxu0 %v894_v4  ;;  %v69_v12 = vld [vmem:[#allocation3] sm:$0xff]  ;;  %v70_v13 = vld [vmem:[#allocation3 + $0x8] sm:$0xff]  ;;  %v71_v14 = vld [vmem:[#allocation3 + $0x10] sm:$0xff]  ;;  %v900_v15 = vpack.c.bf16 %v182_v11, %v176_v10  ;;  %vm152_vm6 = vcmask 1046534   ;;  %vm154_vm7 = vcmask 1047559   ;;  %s1129_s8 = smov [#allocation9]  }
  0x3b   :  { %897 = vmatpush1.bf16.msra.mxu0 %v896_v8  ;;  %v72_v16 = vld [vmem:[#allocation3 + $0x18] sm:$0xff]  ;;  %v73_v17 = vld [vmem:[#allocation3 + $0x20] sm:$0xff]  ;;  %v74_v18 = vld [vmem:[#allocation3 + $0x28] sm:$0xff]  ;;  %v78_v19 = vsel %vm66_vm0, %v69_v12, 0.0  ;;  %v85_v20 = vsel %vm66_vm0, %v70_v13, 0.0  ;;  %v92_v21 = vsel %vm66_vm0, %v71_v14, 0.0 }
  0x3c   :  { %899 = vmatprep.subr.bf16.mxu0 %v898_v9  ;;  %v75_v22 = vld [vmem:[#allocation3 + $0x30] sm:$0xff]  ;;  %v76_v23 = vld [vmem:[#allocation3 + $0x38] sm:$0xff]  ;;  %v79_v24 = vrot.slane %v78_v19, 4  ;;  %v86_v25 = vrot.slane %v85_v20, 4  ;;  %v93_v26 = vrot.slane %v92_v21, 4  ;;  %v99_v27 = vsel %vm66_vm0, %v72_v16, 0.0 }
  0x3d   :  { %v100_v28 = vrot.slane %v99_v27, 4  ;;  %v106_v29 = vsel %vm66_vm0, %v73_v17, 0.0  ;;  %v113_v30 = vsel %vm66_vm0, %v74_v18, 0.0  ;;  %v120_v31 = vsel %vm66_vm0, %v75_v22, 0.0  ;;  %v167_v1 = vld [vmem:[#allocation6 + $0x18] sm:$0xff]  ;;  %v173_v2 = vld [vmem:[#allocation6 + $0x48] sm:$0xff] }
  0x3e   :  { %v80_v32 = vadd.f32 %v79_v24, %v78_v19  ;;  %v87_v33 = vadd.f32 %v86_v25, %v85_v20  ;;  %v94_v34 = vadd.f32 %v93_v26, %v92_v21  ;;  %v107_v35 = vrot.slane %v106_v29, 4  ;;  %v205_v14 = vld [vmem:[#allocation8 + $0x80] sm:$0xff]  ;;  %v206_v19 = vld [vmem:[#allocation8 + $0x88] sm:$0xff]  ;;  %v208_v24 = vld [vmem:[#allocation8 + $0x98] sm:$0xff] }
  0x3f   :  { %901 = vmatpush1.bf16.msra.mxu0 %v900_v15  ;;  %v101_v36 = vadd.f32 %v100_v28, %v99_v27  ;;  %v114_v37 = vrot.slane %v113_v30, 4  ;;  %v121_v38 = vrot.slane %v120_v31, 4  ;;  %v127_v39 = vsel %vm66_vm0, %v76_v23, 0.0  ;;  %v189_v20 = vld [vmem:[#allocation8] sm:$0xff]  ;;  %v190_v21 = vld [vmem:[#allocation8 + $0x8] sm:$0xff]  ;;  %v207_v23 = vld [vmem:[#allocation8 + $0x90] sm:$0xff] }
  0x40   :  { %v81_v40 = vrot.slane %v80_v32, 2  ;;  %v88_v41 = vrot.slane %v87_v33, 2  ;;  %v95_v42 = vrot.slane %v94_v34, 2  ;;  %v108_v43 = vadd.f32 %v107_v35, %v106_v29  ;;  %v68_v27 = vld [vmem:[#allocation2] sm:$0xff]  ;;  %v209_v35 = vld [vmem:[#allocation8 + $0xa0] sm:$0xff] }
  0x41   :  { %v102_v44 = vrot.slane %v101_v36, 2  ;;  %v115_v45 = vadd.f32 %v114_v37, %v113_v30  ;;  %v122_v46 = vadd.f32 %v121_v38, %v120_v31  ;;  %v128_v47 = vrot.slane %v127_v39, 4  ;;  %v191_v31 = vld [vmem:[#allocation8 + $0x10] sm:$0xff] }
  0x42   :  { %v82_v48 = vadd.f32 %v81_v40, %v80_v32  ;;  %v89_v49 = vadd.f32 %v88_v41, %v87_v33  ;;  %v96_v50 = vadd.f32 %v95_v42, %v94_v34  ;;  %v109_v51 = vrot.slane %v108_v43, 2  ;;  %v192_v32 = vld [vmem:[#allocation8 + $0x18] sm:$0xff]  ;;  %v193_v41 = vld [vmem:[#allocation8 + $0x20] sm:$0xff]  ;;  %v194_v42 = vld [vmem:[#allocation8 + $0x28] sm:$0xff] }
  0x43   :  { %v103_v52 = vadd.f32 %v102_v44, %v101_v36  ;;  %v116_v53 = vrot.slane %v115_v45, 2  ;;  %v123_v54 = vrot.slane %v122_v46, 2  ;;  %v129_v55 = vadd.f32 %v128_v47, %v127_v39  ;;  %v210_v36 = vld [vmem:[#allocation8 + $0xa8] sm:$0xff]  ;;  %v212_v44 = vld [vmem:[#allocation8 + $0xb8] sm:$0xff]  ;;  %v195_v47 = vld [vmem:[#allocation8 + $0x30] sm:$0xff] }
  0x44   :  { %v83_v56 = vrot.slane %v82_v48, 1  ;;  %v90_v57 = vrot.slane %v89_v49, 1  ;;  %v97_v58 = vrot.slane %v96_v50, 1  ;;  %v110_v59 = vadd.f32 %v109_v51, %v108_v43  ;;  %v211_v43 = vld [vmem:[#allocation8 + $0xb0] sm:$0xff]  ;;  %v179_v51 = vld [vmem:[#allocation6 + $0x78] sm:$0xff] }
  0x45   :  { %v104_v60 = vrot.slane %v103_v52, 1  ;;  %v117_v61 = vadd.f32 %v116_v53, %v115_v45  ;;  %v124_v62 = vadd.f32 %v123_v54, %v122_v46  ;;  %v130_v63 = vrot.slane %v129_v55, 2  ;;  %v213_v53 = vld [vmem:[#allocation8 + $0xc0] sm:$0xff]  ;;  %v214_v54 = vld [vmem:[#allocation8 + $0xc8] sm:$0xff] }
  0x46   :  { %v84_v3 = vadd.f32 %v83_v56, %v82_v48  ;;  %v91_v4 = vadd.f32 %v90_v57, %v89_v49  ;;  %v98_v5 = vadd.f32 %v97_v58, %v96_v50  ;;  %v111_v6 = vrot.slane %v110_v59, 1  ;;  %v196_v48 = vld [vmem:[#allocation8 + $0x38] sm:$0xff]  ;;  %v166_v49 = vld [vmem:[#allocation6 + $0x10] sm:$0xff]  ;;  %v172_v50 = vld [vmem:[#allocation6 + $0x40] sm:$0xff] }
  0x47   :  { %v105_v7 = vadd.f32 %v104_v60, %v103_v52  ;;  %v118_v8 = vrot.slane %v117_v61, 1  ;;  %v125_v9 = vrot.slane %v124_v62, 1  ;;  %v131_v10 = vadd.f32 %v130_v63, %v129_v55  ;;  %v185_v52 = vld [vmem:[#allocation6 + $0xa8] sm:$0xff]  ;;  %v178_v55 = vld [vmem:[#allocation6 + $0x70] sm:$0xff]  ;;  %v184_v63 = vld [vmem:[#allocation6 + $0xa0] sm:$0xff] }
  0x48   :  { %v112_v11 = vadd.f32 %v111_v6, %v110_v59  ;;  %v143_v12 = vsel %vm142_vm1, %v91_v4, %v84_v3  ;;  %v902_v13 = vpack.c.bf16 %v173_v2, %v167_v1  ;;  %v918_v29 = vpack.c.bf16 %v206_v19, %v205_v14  ;;  %v197_v59 = vld [vmem:[#allocation8 + $0x40] sm:$0xff]  ;;  %v198_v60 = vld [vmem:[#allocation8 + $0x48] sm:$0xff]  ;;  %v215_v2 = vld [vmem:[#allocation8 + $0xd0] sm:$0xff] }
  0x49   :  { %v119_v15 = vadd.f32 %v118_v8, %v117_v61  ;;  %v126_v16 = vadd.f32 %v125_v9, %v124_v62  ;;  %v132_v17 = vrot.slane %v131_v10, 1  ;;  %v145_v18 = vsel %vm144_vm2, %v98_v5, %v143_v12  ;;  %v216_v3 = vld [vmem:[#allocation8 + $0xd8] sm:$0xff]  ;;  %v169_v4 = vld [vmem:[#allocation6 + $0x28] sm:$0xff]  ;;  %v199_v9 = vld [vmem:[#allocation8 + $0x50] sm:$0xff] }
  0x4a   :  { %v147_v22 = vsel %vm146_vm3, %v105_v7, %v145_v18  ;;  %903 = vmatprep.subr.bf16.mxu0 %v902_v13  ;;  %v920_v30 = vpack.c.bf16 %v190_v21, %v189_v20  ;;  %v922_v34 = vpack.c.bf16 %v208_v24, %v207_v23  ;;  %919 = vmatprep.subr.bf16.mxu1 %v918_v29  ;;  %v175_v5 = vld [vmem:[#allocation6 + $0x58] sm:$0xff]  ;;  %v168_v12 = vld [vmem:[#allocation6 + $0x20] sm:$0xff]  ;;  %v174_v13 = vld [vmem:[#allocation6 + $0x50] sm:$0xff] }
  0x4b   :  { %v133_v25 = vadd.f32 %v132_v17, %v131_v10  ;;  %v149_v26 = vsel %vm148_vm4, %v112_v11, %v147_v22  ;;  %v924_v39 = vpack.c.bf16 %v192_v32, %v191_v31  ;;  %v926_v40 = vpack.c.bf16 %v210_v36, %v209_v35  ;;  %v200_v10 = vld [vmem:[#allocation8 + $0x58] sm:$0xff]  ;;  %v181_v14 = vld [vmem:[#allocation6 + $0x88] sm:$0xff]  ;;  %v201_v20 = vld [vmem:[#allocation8 + $0x60] sm:$0xff] }
  0x4c   :  { %v151_v28 = vsel %vm150_vm5, %v119_v15, %v149_v26  ;;  %921 = vmatpush3.bf16.msra.mxu1 %v920_v30  ;;  %v928_v45 = vpack.c.bf16 %v194_v42, %v193_v41  ;;  %v930_v46 = vpack.c.bf16 %v212_v44, %v211_v43  ;;  %v932_v56 = vpack.c.bf16 %v196_v48, %v195_v47  ;;  %v187_v15 = vld [vmem:[#allocation6 + $0xb8] sm:$0xff]  ;;  %v218_v17 = vld [vmem:[#allocation8 + $0xe8] sm:$0xff]  ;;  %v180_v23 = vld [vmem:[#allocation6 + $0x80] sm:$0xff] }
  0x4d   :  { %v153_v33 = vsel %vm152_vm6, %v126_v16, %v151_v28  ;;  %923 = vmatprep.subr.bf16.mxu1 %v922_v34  ;;  %v904_v58 = vpack.c.bf16 %v172_v50, %v166_v49  ;;  %v906_v62 = vpack.c.bf16 %v185_v52, %v179_v51  ;;  %v934_v1 = vpack.c.bf16 %v214_v54, %v213_v53  ;;  %v217_v16 = vld [vmem:[#allocation8 + $0xe0] sm:$0xff]  ;;  %v202_v21 = vld [vmem:[#allocation8 + $0x68] sm:$0xff]  ;;  %v186_v24 = vld [vmem:[#allocation6 + $0xb0] sm:$0xff] }
  0x4e   :  { %v155_v37 = vsel %vm154_vm7, %v133_v25, %v153_v33  ;;  %v936_v6 = vpack.c.bf16 %v198_v60, %v197_v59  ;;  %v908_v7 = vpack.c.bf16 %v184_v63, %v178_v55  ;;  %v938_v8 = vpack.c.bf16 %v216_v3, %v215_v2  ;;  %v237_v26 = vld [vmem:[#allocation8 + $0x180] sm:$0xff]  ;;  %v222_v32 = vld [vmem:[#allocation8 + $0x108] sm:$0xff]  ;;  %v239_v33 = vld [vmem:[#allocation8 + $0x190] sm:$0xff] }
  0x4f   :  { %v157_v38 = vadd.f32 %v155_v37, %v68_v27  ;;  %v910_v11 = vpack.c.bf16 %v175_v5, %v169_v4  ;;  %v940_v18 = vpack.c.bf16 %v200_v10, %v199_v9  ;;  %v912_v19 = vpack.c.bf16 %v174_v13, %v168_v12  ;;  %v238_v27 = vld [vmem:[#allocation8 + $0x188] sm:$0xff]  ;;  %v221_v31 = vld [vmem:[#allocation8 + $0x100] sm:$0xff]  ;;  %v240_v34 = vld [vmem:[#allocation8 + $0x198] sm:$0xff] }
  0x50   :  { %925 = vmatpush3.bf16.msra.mxu1 %v924_v39  ;;  %v914_v22 = vpack.c.bf16 %v187_v15, %v181_v14  ;;  %v942_v25 = vpack.c.bf16 %v218_v17, %v217_v16  ;;  %v944_v28 = vpack.c.bf16 %v202_v21, %v201_v20  ;;  %v916_v29 = vpack.c.bf16 %v186_v24, %v180_v23  ;;  %v223_v37 = vld [vmem:[#allocation8 + $0x110] sm:$0xff]  ;;  %v241_v39 = vld [vmem:[#allocation8 + $0x1a0] sm:$0xff]  ;;  %v226_v43 = vld [vmem:[#allocation8 + $0x128] sm:$0xff] }
  0x51   :  { %158 = vst.msk [vmem:[#allocation2] sm:$0xff] %vm66_vm0, %v157_v38  ;;  %927 = vmatprep.subr.bf16.mxu1 %v926_v40  ;;  %v950_v30 = vpack.c.bf16 %v238_v27, %v237_v26  ;;  %v952_v35 = vpack.c.bf16 %v222_v32, %v221_v31  ;;  %v954_v36 = vpack.c.bf16 %v240_v34, %v239_v33  ;;  %v224_v38 = vld [vmem:[#allocation8 + $0x118] sm:$0xff]  ;;  %v242_v40 = vld [vmem:[#allocation8 + $0x1a8] sm:$0xff]  ;;  %v225_v42 = vld [vmem:[#allocation8 + $0x120] sm:$0xff]  ;;  %v287_v21 = vlaneseq }
  0x52   :  { %v958_v41 = vpack.c.bf16 %v242_v40, %v241_v39  ;;  %v243_v44 = vld [vmem:[#allocation8 + $0x1b0] sm:$0xff]  ;;  %v228_v49 = vld [vmem:[#allocation8 + $0x138] sm:$0xff]  ;;  %v245_v50 = vld [vmem:[#allocation8 + $0x1c0] sm:$0xff] }
  0x53   :  { %v227_v48 = vld [vmem:[#allocation8 + $0x130] sm:$0xff]  ;;  %v246_v51 = vld [vmem:[#allocation8 + $0x1c8] sm:$0xff]  ;;  %v229_v54 = vld [vmem:[#allocation8 + $0x140] sm:$0xff] }
  0x54   :  { %929 = vmatpush3.bf16.msra.mxu1 %v928_v45  ;;  %v244_v45 = vld [vmem:[#allocation8 + $0x1b8] sm:$0xff]  ;;  %v964_v52 = vpack.c.bf16 %v228_v49, %v227_v48  ;;  %v966_v53 = vpack.c.bf16 %v246_v51, %v245_v50  ;;  %v230_v55 = vld [vmem:[#allocation8 + $0x148] sm:$0xff]  ;;  %v247_v59 = vld [vmem:[#allocation8 + $0x1d0] sm:$0xff] }
  0x55   :  { %931 = vmatprep.subr.bf16.mxu1 %v930_v46  ;;  %v960_v46 = vpack.c.bf16 %v226_v43, %v225_v42  ;;  %v962_v47 = vpack.c.bf16 %v244_v45, %v243_v44  ;;  %v204_v63 = vld [vmem:[#allocation8 + $0x78] sm:$0xff]  ;;  %v231_v3 = vld [vmem:[#allocation8 + $0x150] sm:$0xff]  ;;  %v270_v10 = vld [vmem:[#allocation8 + $0x288] sm:$0xff] }
  0x56   :  { %v232_v4 = vld [vmem:[#allocation8 + $0x158] sm:$0xff]  ;;  %v234_v12 = vld [vmem:[#allocation8 + $0x168] sm:$0xff]  ;;  %v251_v15 = vld [vmem:[#allocation8 + $0x1f0] sm:$0xff] }
  0x57   :  { %v972_v5 = vpack.c.bf16 %v232_v4, %v231_v3  ;;  %v252_v16 = vld [vmem:[#allocation8 + $0x1f8] sm:$0xff]  ;;  %v253_v32 = vld [vmem:[#allocation8 + $0x200] sm:$0xff]  ;;  %v254_v33 = vld [vmem:[#allocation8 + $0x208] sm:$0xff] }
  0x58   :  { %v162_v57 = vld [vmem:[#allocation2] sm:$0xff]  ;;  %933 = vmatpush3.bf16.msra.mxu1 %v932_v56  ;;  %v968_v56 = vpack.c.bf16 %v230_v55, %v229_v54  ;;  %v978_v17 = vpack.c.bf16 %v252_v16, %v251_v15  ;;  %v984_v39 = vpack.c.bf16 %v254_v33, %v253_v32  ;;  %v255_v42 = vld [vmem:[#allocation8 + $0x210] sm:$0xff]  ;;  %v273_v45 = vld [vmem:[#allocation8 + $0x2a0] sm:$0xff] }
  0x59   :  { %v163_v61 = vmul.f32 0.125, %v162_v57  ;;  %935 = vmatprep.subr.bf16.mxu1 %v934_v1  ;;  %v219_v57 = vld [vmem:[#allocation8 + $0xf0] sm:$0xff]  ;;  %v1225_v24 = vld [vmem:[%s1256_s2] sm:$0x3f] }
  0x5a   :  { %v256_v43 = vld [vmem:[#allocation8 + $0x218] sm:$0xff]  ;;  %v275_v55 = vld [vmem:[#allocation8 + $0x2b0] sm:$0xff] }
  0x5b   :  { %784 = vmatmul.mubr.msk.f32.vlgmr.msra.gmra.mrb[0].mxu0 %vm66_vm0, %v163_v61  ;;  %v988_v48 = vpack.c.bf16 %v256_v43, %v255_v42  ;;  %v263_v16 = vld [vmem:[#allocation8 + $0x250] sm:$0xff] }
  0x5c   :  { %905 = vmatpush1.bf16.msra.mxu0 %v904_v58  ;;  %455 = vmatprep.mubr.f32.mxu0 %v1128_v0  ;;  %v220_v58 = vld [vmem:[#allocation8 + $0xf8] sm:$0xff]  ;;  %v267_v33 = vld [vmem:[#allocation8 + $0x270] sm:$0xff] }
  0x5d   :  { %907 = vmatprep.subr.bf16.mxu0 %v906_v62  ;;  %937 = vmatpush3.bf16.msra.mxu1 %v936_v6  ;;  %v946_v60 = vpack.c.bf16 %v220_v58, %v219_v57  ;;  %v203_v62 = vld [vmem:[#allocation8 + $0x70] sm:$0xff]  ;;  %v249_v6 = vld [vmem:[#allocation8 + $0x1e0] sm:$0xff] }
  0x5e   :  { %939 = vmatprep.subr.bf16.mxu1 %v938_v8  ;;  %v948_v2 = vpack.c.bf16 %v204_v63, %v203_v62  ;;  %v269_v8 = vld [vmem:[#allocation8 + $0x280] sm:$0xff]  ;;  %v259_v62 = vld [vmem:[#allocation8 + $0x230] sm:$0xff]  ;;  %v260_v63 = vld [vmem:[#allocation8 + $0x238] sm:$0xff] }
  0x5f   :  { %v982_v13 = vpack.c.bf16 %v270_v10, %v269_v8  ;;  %v996_v4 = vpack.c.bf16 %v260_v63, %v259_v62  ;;  %v262_v8 = vld [vmem:[#allocation8 + $0x248] sm:$0xff]  ;;  %v279_v10 = vld [vmem:[#allocation8 + $0x2d0] sm:$0xff] }
  0x60   :  { %909 = vmatpush1.bf16.msra.mxu0 %v908_v7  ;;  %v250_v7 = vld [vmem:[#allocation8 + $0x1e8] sm:$0xff] }
  0x61   :  { %911 = vmatprep.subr.bf16.mxu0 %v910_v11  ;;  %941 = vmatpush3.bf16.msra.mxu1 %v940_v18  ;;  %v974_v9 = vpack.c.bf16 %v250_v7, %v249_v6  ;;  %v233_v11 = vld [vmem:[#allocation8 + $0x160] sm:$0xff]  ;;  %v235_v18 = vld [vmem:[#allocation8 + $0x170] sm:$0xff] }
  0x62   :  { %943 = vmatprep.subr.bf16.mxu1 %v942_v25  ;;  %v976_v14 = vpack.c.bf16 %v234_v12, %v233_v11  ;;  %v261_v7 = vld [vmem:[#allocation8 + $0x240] sm:$0xff]  ;;  %v280_v11 = vld [vmem:[#allocation8 + $0x2d8] sm:$0xff] }
  0x63   :  { %785 = vmatmul.mubr.msk.f32.vlgmr.msra.gmra.mrb[2].mxu0 %vm66_vm0, %v163_v61  ;;  %v1002_v15 = vpack.c.bf16 %v280_v11, %v279_v10 }
  0x64   :  { %913 = vmatpush1.bf16.msra.mxu0 %v912_v19  ;;  %526 = vmatprep.mubr.f32.mxu0 %v1128_v0  ;;  %v956_v0 = vpack.c.bf16 %v224_v38, %v223_v37  ;;  %v236_v19 = vld [vmem:[#allocation8 + $0x178] sm:$0xff] }
  0x65   :  { %915 = vmatprep.subr.bf16.mxu0 %v914_v22  ;;  %945 = vmatpush3.bf16.msra.mxu1 %v944_v28  ;;  %v980_v20 = vpack.c.bf16 %v236_v19, %v235_v18  ;;  %v1219_v22 = vshrl.u32 %v287_v21, 7  ;;  %v272_v37 = vld [vmem:[#allocation8 + $0x298] sm:$0xff]  ;;  %v281_v18 = vld [vmem:[#allocation8 + $0x2e0] sm:$0xff]  ;;  %v282_v19 = vld [vmem:[#allocation8 + $0x2e8] sm:$0xff] }
  0x66   :  { %947 = vmatprep.subr.bf16.mxu1 %v946_v60 }
  0x67   :  { %v289_v23 = vsub.s32 0, %v1219_v22  ;;  %v293_v25 = vsub.s32 1, %v1219_v22  ;;  %v297_v31 = vsub.s32 2, %v1219_v22  ;;  %v309_v57 = vsub.s32 5, %v1219_v22 }
  0x68   :  { %917 = vmatpush1.bf16.msra.mxu0 %v916_v29 }
  0x69   :  { %951 = vmatprep.subr.bf16.mxu0 %v950_v30  ;;  %949 = vmatpush3.bf16.msra.mxu1 %v948_v2  ;;  %v290_v26 = vrot.slane %v1225_v24, %v289_v23  ;;  %v294_v27 = vrot.slane %v1225_v24, %v293_v25  ;;  %v278_v2 = vld [vmem:[#allocation8 + $0x2c8] sm:$0xff]  ;;  %v310_v3 = vrot.slane %v1225_v24, %v309_v57  ;;  %v305_v23 = vsub.s32 4, %v1219_v22 }
  0x6a   :  { %983 = vmatprep.subr.bf16.mxu1 %v982_v13  ;;  %v1000_v13 = vpack.c.bf16 %v262_v8, %v261_v7  ;;  %v1006_v25 = vpack.c.bf16 %v282_v19, %v281_v18 }
  0x6b   :  { %786 = vmatmul.mubr.msk.f32.vlgmr.msra.gmra.mrb[4].mxu0 %vm66_vm0, %v163_v61  ;;  %v248_v61 = vld [vmem:[#allocation8 + $0x1d8] sm:$0xff] }
  0x6c   :  { %953 = vmatpush3.bf16.msra.mxu0 %v952_v35  ;;  %v970_v1 = vpack.c.bf16 %v248_v61, %v247_v59  ;;  %v301_v35 = vsub.s32 3, %v1219_v22 }
  0x6d   :  { %955 = vmatprep.subr.bf16.mxu0 %v954_v36  ;;  %v271_v36 = vld [vmem:[#allocation8 + $0x290] sm:$0xff] }
  0x6e   :  { %v302_v44 = vrot.slane %v1225_v24, %v301_v35 }
  0x70   :  { %957 = vmatpush3.bf16.msra.mxu0 %v956_v0  ;;  %v298_v0 = vrot.slane %v1225_v24, %v297_v31  ;;  %v306_v31 = vrot.slane %v1225_v24, %v305_v23 }
  0x71   :  { %959 = vmatprep.subr.bf16.mxu0 %v958_v41  ;;  %v986_v41 = vpack.c.bf16 %v272_v37, %v271_v36 }
  0x74   :  { %961 = vmatpush3.bf16.msra.mxu0 %v960_v46  ;;  %v274_v46 = vld [vmem:[#allocation8 + $0x2a8] sm:$0xff] }
  0x75   :  { %963 = vmatprep.subr.bf16.mxu0 %v962_v47  ;;  %v990_v51 = vpack.c.bf16 %v274_v46, %v273_v45 }
  0x78   :  { %965 = vmatpush3.bf16.msra.mxu0 %v964_v52  ;;  %v257_v52 = vld [vmem:[#allocation8 + $0x220] sm:$0xff] }
  0x79   :  { %967 = vmatprep.subr.bf16.mxu0 %v966_v53  ;;  %v258_v53 = vld [vmem:[#allocation8 + $0x228] sm:$0xff] }
  0x7a   :  { %v992_v60 = vpack.c.bf16 %v258_v53, %v257_v52 }
  0x7c   :  { %969 = vmatpush3.bf16.msra.mxu0 %v968_v56  ;;  %v276_v56 = vld [vmem:[#allocation8 + $0x2b8] sm:$0xff] }
  0x7d   :  { %971 = vmatprep.subr.bf16.mxu0 %v970_v1  ;;  %v994_v61 = vpack.c.bf16 %v276_v56, %v275_v55  ;;  %v277_v1 = vld [vmem:[#allocation8 + $0x2c0] sm:$0xff] }
  0x7e   :  { %v998_v6 = vpack.c.bf16 %v278_v2, %v277_v1 }
  0x80   :  { %973 = vmatpush3.bf16.msra.mxu0 %v972_v5 }
  0x81   :  { %975 = vmatprep.subr.bf16.mxu0 %v974_v9 }
  0x84   :  { %977 = vmatpush3.bf16.msra.mxu0 %v976_v14 }
  0x85   :  { %979 = vmatprep.subr.bf16.mxu0 %v978_v17  ;;  %v264_v17 = vld [vmem:[#allocation8 + $0x258] sm:$0xff] }
  0x88   :  { %981 = vmatpush3.bf16.msra.mxu0 %v980_v20  ;;  %v1004_v20 = vpack.c.bf16 %v264_v17, %v263_v16 }
 0x12e   :  { %v386_v28 = vpop.f32.mrb[0].mxu0 }
 0x12f   :  { %v387_v29 = vadd.f32 %v386_v28, %v290_v26  ;;  %v388_v30 = vpop.f32.mrb[1].mxu0  ;;  %v265_v26 = vld [vmem:[#allocation8 + $0x260] sm:$0xff]  ;;  %v283_v28 = vld [vmem:[#allocation8 + $0x2f0] sm:$0xff] }
 0x130   :  { %v389_v34 = vadd.f32 %v388_v30, %v294_v27  ;;  %v266_v27 = vld [vmem:[#allocation8 + $0x268] sm:$0xff] }
 0x131   :  { %v533_v40 = vmax.f32 %v387_v29, 0.0  ;;  %v284_v29 = vld [vmem:[#allocation8 + $0x2f8] sm:$0xff]  ;;  %v1008_v30 = vpack.c.bf16 %v266_v27, %v265_v26 }
 0x132   :  { %v534_v38 = vmax.f32 %v389_v34, 0.0  ;;  %v1010_v32 = vpack.c.bf16 %v284_v29, %v283_v28  ;;  %v268_v34 = vld [vmem:[#allocation8 + $0x278] sm:$0xff] }
 0x133   :  { %v1012_v35 = vpack.c.bf16 %v268_v34, %v267_v33 }
 0x134   :  { %609 = vmatprep.mubr.f32.mxu1 %v534_v38 }
 0x135   :  { %610 = vmatmul.mubr.f32.vlgmr.msra.gmra.mrb[0].mxu1 %v533_v40  ;;  %v787_v40 = vld [vmem:[%s1258_s4] ss:$0 sm:$0xff]  ;;  %s774_s4 = sshll.u32 %s1129_s8, 4  ;;  %s775_s4 = int_to_ptr.vmem [resolvable:$true] %s774_s4 }
 0x136   :  { %v457_v47 = vpop.f32.mrb[2].mxu0  ;;  %985 = vmatpush3.bf16.msra.mxu1 %v984_v39  ;;  %s1093_s9 = scalar_lea.vmem %s775_s4, 128  ;;  %p1098_p11 = scmp.lt.s32.totalorder %s775_s4, %s775_s4 }
 0x137   :  { %v458_v49 = vadd.f32 %v457_v47, %v298_v0  ;;  %v459_v50 = vpop.f32.mrb[3].mxu0  ;;  %987 = vmatprep.subr.bf16.mxu1 %v986_v41  ;;  %p1094_p10 = scmp.ne.s32.totalorder %s775_s4, %s1093_s9  ;;  %p1099_p12 = scmp.lt.s32.totalorder %s1093_s9, %s1093_s9 }
 0x138   :  { %v460_v54 = vadd.f32 %v459_v50, %v302_v44 }
 0x139   :  { %v535_v58 = vmax.f32 %v458_v49, 0.0  ;;  %p1100_p13 = por %p1099_p12, %p1098_p11 }
 0x13a   :  { %v536_v59 = vmax.f32 %v460_v54, 0.0  ;;  %989 = vmatpush3.bf16.msra.mxu1 %v988_v48 }
 0x13b   :  { %991 = vmatprep.subr.bf16.mxu1 %v990_v51  ;;  %v756_v51 = vand.u32 127, %v287_v21  ;;  %p1101_p0 = pnand %p1100_p13, %p1094_p10 }
 0x13c   :  { %679 = vmatprep.mubr.f32.mxu0 %v536_v59 }
 0x13d   :  { %680 = vmatmul.mubr.f32.vlgmr.msra.gmra.mrb[6].mxu0 %v535_v58  ;;  %vm757_vm8 = vcmp.eq.s32.totalorder %v756_v51, 10  ;;  %vm758_vm9 = vcmp.eq.s32.totalorder %v756_v51, 11 }
 0x13e   :  { %993 = vmatpush3.bf16.msra.mxu1 %v992_v60  ;;  %v528_v5 = vpop.f32.mrb[4].mxu0  ;;  %vm759_vm10 = vmor %vm757_vm8, %vm758_vm9 }
 0x13f   :  { %995 = vmatprep.subr.bf16.mxu1 %v994_v61  ;;  %v530_v9 = vpop.f32.mrb[5].mxu0  ;;  %v529_v36 = vadd.f32 %v528_v5, %v306_v31 }
 0x140   :  { %v531_v12 = vadd.f32 %v530_v9, %v310_v3 }
 0x141   :  { %v537_v37 = vmax.f32 %v529_v36, 0.0 }
 0x142   :  { %997 = vmatpush3.bf16.msra.mxu1 %v996_v4  ;;  %v538_v14 = vmax.f32 %v531_v12, 0.0 }
 0x143   :  { %999 = vmatprep.subr.bf16.mxu1 %v998_v6 }
 0x144   :  { %749 = vmatprep.mubr.f32.mxu1 %v538_v14 }
 0x146   :  { %1001 = vmatpush3.bf16.msra.mxu1 %v1000_v13 }
 0x147   :  { %1003 = vmatprep.subr.bf16.mxu1 %v1002_v15 }
 0x14a   :  { %1005 = vmatpush3.bf16.msra.mxu1 %v1004_v20 }
 0x14b   :  { %1007 = vmatprep.subr.bf16.mxu1 %v1006_v25 }
 0x14e   :  { %1009 = vmatpush3.bf16.msra.mxu1 %v1008_v30 }
 0x14f   :  { %1011 = vmatprep.subr.bf16.mxu1 %v1010_v32 }
 0x152   :  { %1013 = vmatpush3.bf16.msra.mxu1 %v1012_v35 }
 0x155   :  { %750 = vmatmul.mubr.f32.vlgmr.msra.gmra.mrb[2].mxu1 %v537_v37 }
 0x208   :  { %v821_v22 = vpop.f32.mrb[0].mxu1 }
 0x209   :  { %v822_v38 = vpop.f32.mrb[1].mxu1 }
 0x20a   :  { %v823_v39 = vadd.f32 %v822_v38, %v821_v22 }
 0x20c   :  { %v612_v41 = vadd.f32 %v823_v39, %v787_v40 }
 0x210   :  { %v856_v0 = vpop.f32.mrb[6].mxu0 }
 0x211   :  { %v857_v24 = vpop.f32.mrb[7].mxu0 }
 0x212   :  { %v858_v42 = vadd.f32 %v857_v24, %v856_v0 }
 0x214   :  { %v682_v43 = vadd.f32 %v858_v42, %v612_v41 }
 0x228   :  { %v891_v44 = vpop.f32.mrb[2].mxu1 }
 0x229   :  { %v892_v45 = vpop.f32.mrb[3].mxu1 }
 0x22a   :  { %v893_v46 = vadd.f32 %v892_v45, %v891_v44 }
 0x22c   :  { %v752_v47 = vadd.f32 %v893_v46, %v682_v43 }
 0x22e   :  { %v788_v48 = vmul.f32 -1.442695, %v752_v47 }
 0x230   :  { %1023 = vpow2.f32 %v788_v48 }
 0x23a   :  { %v1024_v49 = vpop.eup %1023 }
 0x23b   :  { %v763_v50 = vadd.f32 1.0, %v1024_v49 }
 0x23d   :  { %1025 = vrcp.f32 %v763_v50 }
 0x247   :  { %v1026_v52 = vpop.eup %1025 }
 0x248   :  { %v766_v53 = vsel %vm759_vm10, %v1026_v52, %v752_v47 }
 0x249   :  { %767 = vst [vmem:[#allocation9] sm:$0xff] %v766_v53 }
 0x24a   :  { %1104 = shalt.err (!%p1101_p0)
}
 0x24b   :  { %s1105_s12 = scalar_lea.hbm %s1259_s5, 128 }
 0x24c   :  { %p1106_p1 = scmp.ne.s32.totalorder %s1259_s5, %s1105_s12  ;;  %p1109_p2 = scmp.lt.u32.totalorder %s1105_s12, %s1259_s5 }
 0x24e   :  { %p1111_p3 = pnand %p1109_p2, %p1106_p1 }
 0x250   :  { %1114 = shalt.err (!%p1111_p3)
}
 0x251   :  { %777 = dma.vmem_to_hbm [thread:$0]  %s775_s4, 128, %s1259_s5, [#allocation5]  }
 0x252   :  { %1119 = dma.done.wait [#allocation5], 128  }
 0x253   :  { %1120 = vsyncadd [#allocation5], 4294967168 }
 0x254   :  { %781 = vsyncpa [#allocation4], 1 }
 0x255   :  { %782 = vsyncpa [#allocation7], 1 }
 0x256   :  { %783 = vsyncpa [#allocation5], 1 }

// kernel: tpu_custom_call.1
= control target key start
LH: loop header
LB: loop body
LE: loop exit
PB: predicated region body
PF: predicated region fallthrough
CT: control target
= control target key end

     0   :  { %10 = vsyncpa [#allocation4], 0  ;;  %s1254_s0 = inlined_call_operand.hbm [shape: f32[8,8,32], index: 0, kind: input, shape index: {}]   ;;  %s1255_s1 = inlined_call_operand.hbm [shape: f32[32,768], index: 1, kind: input, shape index: {}]   ;;  %s1256_s2 = inlined_call_operand.vmem [shape: f32[1,768], index: 2, kind: input, shape index: {}]   ;;  %s1257_s3 = inlined_call_operand.hbm [shape: f32[768,128], index: 3, kind: input, shape index: {}]   ;;  %s1258_s4 = inlined_call_operand.vmem [shape: f32[1,128], index: 4, kind: input, shape index: {}]   ;;  %s1259_s5 = inlined_call_operand.hbm [shape: f32[8,128], index: 5, kind: output, shape index: {}]  }
   0x1   :  { %11 = vsyncpa [#allocation7], 0 }
   0x2   :  { %12 = vsyncpa [#allocation5], 0  ;;  %s1121_s18 = smov [#allocation6]   ;;  %s1027_s22 = scalar_lea.hbm %s1255_s1, 3072 }
   0x3   :  { %s30_s19 = sshll.u32 %s1121_s18, 4  ;;  %p1028_p0 = scmp.ne.s32.totalorder %s1255_s1, %s1027_s22  ;;  %s31_s19 = int_to_ptr.vmem [resolvable:$true] %s30_s19 }
   0x4   :  { %p1031_p1 = scmp.lt.u32.totalorder %s1027_s22, %s1255_s1 }
   0x6   :  { %p1033_p2 = pnand %p1031_p1, %p1028_p0 }
   0x8   :  { %1036 = shalt.err (!%p1033_p2)
}
   0x9   :  { %s1037_s27 = scalar_lea.vmem %s31_s19, 3072  ;;  %p1042_p4 = scmp.lt.s32.totalorder %s31_s19, %s31_s19 }
   0xa   :  { %p1038_p3 = scmp.ne.s32.totalorder %s31_s19, %s1037_s27  ;;  %p1043_p5 = scmp.lt.s32.totalorder %s1037_s27, %s1037_s27 }
   0xc   :  { %p1044_p6 = por %p1043_p5, %p1042_p4 }
   0xe   :  { %p1045_p7 = pnand %p1044_p6, %p1038_p3 }
  0x10   :  { %1048 = shalt.err (!%p1045_p7)
}
  0x11   :  { %s1122_s28 = smov 768   ;;  %s1123_s29 = smov 48  }
  0x12   :  { %36 = dma.hbm_to_vmem [thread:$0]  %s1255_s1, 3072, %s31_s19, [#allocation7], %s1122_s28, %s1122_s28, %s1123_s29  }
  0x13   :  { %s1124_s7 = smov [#allocation3]   ;;  %s1049_s11 = scalar_lea.hbm %s1254_s0, 1024 }
  0x14   :  { %s18_s8 = sshll.u32 %s1124_s7, 4  ;;  %p1050_p8 = scmp.ne.s32.totalorder %s1254_s0, %s1049_s11  ;;  %s19_s8 = int_to_ptr.vmem [resolvable:$true] %s18_s8 }
  0x15   :  { %p1053_p9 = scmp.lt.u32.totalorder %s1049_s11, %s1254_s0 }
  0x17   :  { %p1055_p10 = pnand %p1053_p9, %p1050_p8 }
  0x19   :  { %1058 = shalt.err (!%p1055_p10)
}
  0x1a   :  { %s1059_s16 = scalar_lea.vmem %s19_s8, 1024  ;;  %p1064_p12 = scmp.lt.s32.totalorder %s19_s8, %s19_s8 }
  0x1b   :  { %p1060_p11 = scmp.ne.s32.totalorder %s19_s8, %s1059_s16  ;;  %p1065_p13 = scmp.lt.s32.totalorder %s1059_s16, %s1059_s16 }
  0x1d   :  { %p1066_p0 = por %p1065_p13, %p1064_p12 }
  0x1f   :  { %p1067_p1 = pnand %p1066_p0, %p1060_p11 }
  0x21   :  { %1070 = shalt.err (!%p1067_p1)
}
  0x22   :  { %s1125_s1 = smov 128   ;;  %s1126_s17 = smov 8  }
  0x23   :  { %24 = dma.hbm_to_vmem [thread:$0]  %s1254_s0, 1024, %s19_s8, [#allocation4], %s1125_s1, %s1125_s1, %s1126_s17  }
  0x24   :  { %s1127_s20 = smov [#allocation8]   ;;  %s1071_s24 = scalar_lea.hbm %s1257_s3, 12288 }
  0x25   :  { %s44_s21 = sshll.u32 %s1127_s20, 4  ;;  %p1072_p2 = scmp.ne.s32.totalorder %s1257_s3, %s1071_s24  ;;  %s45_s21 = int_to_ptr.vmem [resolvable:$true] %s44_s21 }
  0x26   :  { %p1075_p3 = scmp.lt.u32.totalorder %s1071_s24, %s1257_s3 }
  0x28   :  { %p1077_p4 = pnand %p1075_p3, %p1072_p2 }
  0x2a   :  { %1080 = shalt.err (!%p1077_p4)
}
  0x2b   :  { %s1081_s29 = scalar_lea.vmem %s45_s21, 12288  ;;  %p1086_p6 = scmp.lt.s32.totalorder %s45_s21, %s45_s21 }
  0x2c   :  { %p1082_p5 = scmp.ne.s32.totalorder %s45_s21, %s1081_s29  ;;  %p1087_p7 = scmp.lt.s32.totalorder %s1081_s29, %s1081_s29 }
  0x2e   :  { %p1088_p8 = por %p1087_p7, %p1086_p6 }
  0x30   :  { %p1089_p9 = pnand %p1088_p8, %p1082_p5 }
  0x32   :  { %1092 = shalt.err (!%p1089_p9)
}
  0x33   :  { %50 = dma.hbm_to_vmem [thread:$0]  %s1257_s3, 12288, %s45_s21, [#allocation7], %s1125_s1, %s1125_s1, %s1126_s17  }
  0x34   :  { %1115 = dma.done.wait [#allocation4], 1024  }
  0x35   :  { %1116 = vsyncadd [#allocation4], 4294966272 }
  0x36   :  { %1117 = dma.done.wait [#allocation7], 15360  }
  0x37   :  { %1118 = vsyncadd [#allocation7], 4294951936  ;;  %vm66_vm0 = vcmask 261120   ;;  %v1128_v0 = vmov 0.0   ;;  %v165_v1 = vld [vmem:[#allocation6 + $0x8] sm:$0xff]  ;;  %v171_v2 = vld [vmem:[#allocation6 + $0x38] sm:$0xff] }
  0x38   :  { %67 = vst.msk [vmem:[#allocation2] sm:$0xff] %vm66_vm0, %v1128_v0  ;;  %384 = vmatprep.mubr.f32.mxu0 %v1128_v0  ;;  %v164_v3 = vld [vmem:[#allocation6] sm:$0xff]  ;;  %v894_v4 = vpack.c.bf16 %v171_v2, %v165_v1  ;;  %v170_v5 = vld [vmem:[#allocation6 + $0x30] sm:$0xff]  ;;  %v177_v6 = vld [vmem:[#allocation6 + $0x68] sm:$0xff]  ;;  %vm142_vm1 = vcmask 1041409   ;;  %vm144_vm2 = vcmask 1042434  }
  0x39   :  { %v183_v7 = vld [vmem:[#allocation6 + $0x98] sm:$0xff]  ;;  %v896_v8 = vpack.c.bf16 %v170_v5, %v164_v3  ;;  %v176_v10 = vld [vmem:[#allocation6 + $0x60] sm:$0xff]  ;;  %v182_v11 = vld [vmem:[#allocation6 + $0x90] sm:$0xff]  ;;  %vm146_vm3 = vcmask 1043459   ;;  %vm148_vm4 = vcmask 1044484   ;;  %vm150_vm5 = vcmask 1045509  }
  0x3a   :  { %v898_v9 = vpack.c.bf16 %v183_v7, %v177_v6  ;;  %895 = vmatprep.subr.bf16.mxu0 %v894_v4  ;;  %v69_v12 = vld [vmem:[#allocation3] sm:$0xff]  ;;  %v70_v13 = vld [vmem:[#allocation3 + $0x8] sm:$0xff]  ;;  %v71_v14 = vld [vmem:[#allocation3 + $0x10] sm:$0xff]  ;;  %v900_v15 = vpack.c.bf16 %v182_v11, %v176_v10  ;;  %vm152_vm6 = vcmask 1046534   ;;  %vm154_vm7 = vcmask 1047559   ;;  %s1129_s8 = smov [#allocation9]  }
  0x3b   :  { %897 = vmatpush1.bf16.msra.mxu0 %v896_v8  ;;  %v72_v16 = vld [vmem:[#allocation3 + $0x18] sm:$0xff]  ;;  %v73_v17 = vld [vmem:[#allocation3 + $0x20] sm:$0xff]  ;;  %v74_v18 = vld [vmem:[#allocation3 + $0x28] sm:$0xff]  ;;  %v78_v19 = vsel %vm66_vm0, %v69_v12, 0.0  ;;  %v85_v20 = vsel %vm66_vm0, %v70_v13, 0.0  ;;  %v92_v21 = vsel %vm66_vm0, %v71_v14, 0.0 }
  0x3c   :  { %899 = vmatprep.subr.bf16.mxu0 %v898_v9  ;;  %v75_v22 = vld [vmem:[#allocation3 + $0x30] sm:$0xff]  ;;  %v76_v23 = vld [vmem:[#allocation3 + $0x38] sm:$0xff]  ;;  %v79_v24 = vrot.slane %v78_v19, 4  ;;  %v86_v25 = vrot.slane %v85_v20, 4  ;;  %v93_v26 = vrot.slane %v92_v21, 4  ;;  %v99_v27 = vsel %vm66_vm0, %v72_v16, 0.0 }
  0x3d   :  { %v100_v28 = vrot.slane %v99_v27, 4  ;;  %v106_v29 = vsel %vm66_vm0, %v73_v17, 0.0  ;;  %v113_v30 = vsel %vm66_vm0, %v74_v18, 0.0  ;;  %v120_v31 = vsel %vm66_vm0, %v75_v22, 0.0  ;;  %v167_v1 = vld [vmem:[#allocation6 + $0x18] sm:$0xff]  ;;  %v173_v2 = vld [vmem:[#allocation6 + $0x48] sm:$0xff] }
  0x3e   :  { %v80_v32 = vadd.f32 %v79_v24, %v78_v19  ;;  %v87_v33 = vadd.f32 %v86_v25, %v85_v20  ;;  %v94_v34 = vadd.f32 %v93_v26, %v92_v21  ;;  %v107_v35 = vrot.slane %v106_v29, 4  ;;  %v205_v14 = vld [vmem:[#allocation8 + $0x80] sm:$0xff]  ;;  %v206_v19 = vld [vmem:[#allocation8 + $0x88] sm:$0xff]  ;;  %v208_v24 = vld [vmem:[#allocation8 + $0x98] sm:$0xff] }
  0x3f   :  { %901 = vmatpush1.bf16.msra.mxu0 %v900_v15  ;;  %v101_v36 = vadd.f32 %v100_v28, %v99_v27  ;;  %v114_v37 = vrot.slane %v113_v30, 4  ;;  %v121_v38 = vrot.slane %v120_v31, 4  ;;  %v127_v39 = vsel %vm66_vm0, %v76_v23, 0.0  ;;  %v189_v20 = vld [vmem:[#allocation8] sm:$0xff]  ;;  %v190_v21 = vld [vmem:[#allocation8 + $0x8] sm:$0xff]  ;;  %v207_v23 = vld [vmem:[#allocation8 + $0x90] sm:$0xff] }
  0x40   :  { %v81_v40 = vrot.slane %v80_v32, 2  ;;  %v88_v41 = vrot.slane %v87_v33, 2  ;;  %v95_v42 = vrot.slane %v94_v34, 2  ;;  %v108_v43 = vadd.f32 %v107_v35, %v106_v29  ;;  %v68_v27 = vld [vmem:[#allocation2] sm:$0xff]  ;;  %v209_v35 = vld [vmem:[#allocation8 + $0xa0] sm:$0xff] }
  0x41   :  { %v102_v44 = vrot.slane %v101_v36, 2  ;;  %v115_v45 = vadd.f32 %v114_v37, %v113_v30  ;;  %v122_v46 = vadd.f32 %v121_v38, %v120_v31  ;;  %v128_v47 = vrot.slane %v127_v39, 4  ;;  %v191_v31 = vld [vmem:[#allocation8 + $0x10] sm:$0xff] }
  0x42   :  { %v82_v48 = vadd.f32 %v81_v40, %v80_v32  ;;  %v89_v49 = vadd.f32 %v88_v41, %v87_v33  ;;  %v96_v50 = vadd.f32 %v95_v42, %v94_v34  ;;  %v109_v51 = vrot.slane %v108_v43, 2  ;;  %v192_v32 = vld [vmem:[#allocation8 + $0x18] sm:$0xff]  ;;  %v193_v41 = vld [vmem:[#allocation8 + $0x20] sm:$0xff]  ;;  %v194_v42 = vld [vmem:[#allocation8 + $0x28] sm:$0xff] }
  0x43   :  { %v103_v52 = vadd.f32 %v102_v44, %v101_v36  ;;  %v116_v53 = vrot.slane %v115_v45, 2  ;;  %v123_v54 = vrot.slane %v122_v46, 2  ;;  %v129_v55 = vadd.f32 %v128_v47, %v127_v39  ;;  %v210_v36 = vld [vmem:[#allocation8 + $0xa8] sm:$0xff]  ;;  %v212_v44 = vld [vmem:[#allocation8 + $0xb8] sm:$0xff]  ;;  %v195_v47 = vld [vmem:[#allocation8 + $0x30] sm:$0xff] }
  0x44   :  { %v83_v56 = vrot.slane %v82_v48, 1  ;;  %v90_v57 = vrot.slane %v89_v49, 1  ;;  %v97_v58 = vrot.slane %v96_v50, 1  ;;  %v110_v59 = vadd.f32 %v109_v51, %v108_v43  ;;  %v211_v43 = vld [vmem:[#allocation8 + $0xb0] sm:$0xff]  ;;  %v179_v51 = vld [vmem:[#allocation6 + $0x78] sm:$0xff] }
  0x45   :  { %v104_v60 = vrot.slane %v103_v52, 1  ;;  %v117_v61 = vadd.f32 %v116_v53, %v115_v45  ;;  %v124_v62 = vadd.f32 %v123_v54, %v122_v46  ;;  %v130_v63 = vrot.slane %v129_v55, 2  ;;  %v213_v53 = vld [vmem:[#allocation8 + $0xc0] sm:$0xff]  ;;  %v214_v54 = vld [vmem:[#allocation8 + $0xc8] sm:$0xff] }
  0x46   :  { %v84_v3 = vadd.f32 %v83_v56, %v82_v48  ;;  %v91_v4 = vadd.f32 %v90_v57, %v89_v49  ;;  %v98_v5 = vadd.f32 %v97_v58, %v96_v50  ;;  %v111_v6 = vrot.slane %v110_v59, 1  ;;  %v196_v48 = vld [vmem:[#allocation8 + $0x38] sm:$0xff]  ;;  %v166_v49 = vld [vmem:[#allocation6 + $0x10] sm:$0xff]  ;;  %v172_v50 = vld [vmem:[#allocation6 + $0x40] sm:$0xff] }
  0x47   :  { %v105_v7 = vadd.f32 %v104_v60, %v103_v52  ;;  %v118_v8 = vrot.slane %v117_v61, 1  ;;  %v125_v9 = vrot.slane %v124_v62, 1  ;;  %v131_v10 = vadd.f32 %v130_v63, %v129_v55  ;;  %v185_v52 = vld [vmem:[#allocation6 + $0xa8] sm:$0xff]  ;;  %v178_v55 = vld [vmem:[#allocation6 + $0x70] sm:$0xff]  ;;  %v184_v63 = vld [vmem:[#allocation6 + $0xa0] sm:$0xff] }
  0x48   :  { %v112_v11 = vadd.f32 %v111_v6, %v110_v59  ;;  %v143_v12 = vsel %vm142_vm1, %v91_v4, %v84_v3  ;;  %v902_v13 = vpack.c.bf16 %v173_v2, %v167_v1  ;;  %v918_v29 = vpack.c.bf16 %v206_v19, %v205_v14  ;;  %v197_v59 = vld [vmem:[#allocation8 + $0x40] sm:$0xff]  ;;  %v198_v60 = vld [vmem:[#allocation8 + $0x48] sm:$0xff]  ;;  %v215_v2 = vld [vmem:[#allocation8 + $0xd0] sm:$0xff] }
  0x49   :  { %v119_v15 = vadd.f32 %v118_v8, %v117_v61  ;;  %v126_v16 = vadd.f32 %v125_v9, %v124_v62  ;;  %v132_v17 = vrot.slane %v131_v10, 1  ;;  %v145_v18 = vsel %vm144_vm2, %v98_v5, %v143_v12  ;;  %v216_v3 = vld [vmem:[#allocation8 + $0xd8] sm:$0xff]  ;;  %v169_v4 = vld [vmem:[#allocation6 + $0x28] sm:$0xff]  ;;  %v199_v9 = vld [vmem:[#allocation8 + $0x50] sm:$0xff] }
  0x4a   :  { %v147_v22 = vsel %vm146_vm3, %v105_v7, %v145_v18  ;;  %903 = vmatprep.subr.bf16.mxu0 %v902_v13  ;;  %v920_v30 = vpack.c.bf16 %v190_v21, %v189_v20  ;;  %v922_v34 = vpack.c.bf16 %v208_v24, %v207_v23  ;;  %919 = vmatprep.subr.bf16.mxu1 %v918_v29  ;;  %v175_v5 = vld [vmem:[#allocation6 + $0x58] sm:$0xff]  ;;  %v168_v12 = vld [vmem:[#allocation6 + $0x20] sm:$0xff]  ;;  %v174_v13 = vld [vmem:[#allocation6 + $0x50] sm:$0xff] }
  0x4b   :  { %v133_v25 = vadd.f32 %v132_v17, %v131_v10  ;;  %v149_v26 = vsel %vm148_vm4, %v112_v11, %v147_v22  ;;  %v924_v39 = vpack.c.bf16 %v192_v32, %v191_v31  ;;  %v926_v40 = vpack.c.bf16 %v210_v36, %v209_v35  ;;  %v200_v10 = vld [vmem:[#allocation8 + $0x58] sm:$0xff]  ;;  %v181_v14 = vld [vmem:[#allocation6 + $0x88] sm:$0xff]  ;;  %v201_v20 = vld [vmem:[#allocation8 + $0x60] sm:$0xff] }
  0x4c   :  { %v151_v28 = vsel %vm150_vm5, %v119_v15, %v149_v26  ;;  %921 = vmatpush3.bf16.msra.mxu1 %v920_v30  ;;  %v928_v45 = vpack.c.bf16 %v194_v42, %v193_v41  ;;  %v930_v46 = vpack.c.bf16 %v212_v44, %v211_v43  ;;  %v932_v56 = vpack.c.bf16 %v196_v48, %v195_v47  ;;  %v187_v15 = vld [vmem:[#allocation6 + $0xb8] sm:$0xff]  ;;  %v218_v17 = vld [vmem:[#allocation8 + $0xe8] sm:$0xff]  ;;  %v180_v23 = vld [vmem:[#allocation6 + $0x80] sm:$0xff] }
  0x4d   :  { %v153_v33 = vsel %vm152_vm6, %v126_v16, %v151_v28  ;;  %923 = vmatprep.subr.bf16.mxu1 %v922_v34  ;;  %v904_v58 = vpack.c.bf16 %v172_v50, %v166_v49  ;;  %v906_v62 = vpack.c.bf16 %v185_v52, %v179_v51  ;;  %v934_v1 = vpack.c.bf16 %v214_v54, %v213_v53  ;;  %v217_v16 = vld [vmem:[#allocation8 + $0xe0] sm:$0xff]  ;;  %v202_v21 = vld [vmem:[#allocation8 + $0x68] sm:$0xff]  ;;  %v186_v24 = vld [vmem:[#allocation6 + $0xb0] sm:$0xff] }
  0x4e   :  { %v155_v37 = vsel %vm154_vm7, %v133_v25, %v153_v33  ;;  %v936_v6 = vpack.c.bf16 %v198_v60, %v197_v59  ;;  %v908_v7 = vpack.c.bf16 %v184_v63, %v178_v55  ;;  %v938_v8 = vpack.c.bf16 %v216_v3, %v215_v2  ;;  %v237_v26 = vld [vmem:[#allocation8 + $0x180] sm:$0xff]  ;;  %v222_v32 = vld [vmem:[#allocation8 + $0x108] sm:$0xff]  ;;  %v239_v33 = vld [vmem:[#allocation8 + $0x190] sm:$0xff] }
  0x4f   :  { %v157_v38 = vadd.f32 %v155_v37, %v68_v27  ;;  %v910_v11 = vpack.c.bf16 %v175_v5, %v169_v4  ;;  %v940_v18 = vpack.c.bf16 %v200_v10, %v199_v9  ;;  %v912_v19 = vpack.c.bf16 %v174_v13, %v168_v12  ;;  %v238_v27 = vld [vmem:[#allocation8 + $0x188] sm:$0xff]  ;;  %v221_v31 = vld [vmem:[#allocation8 + $0x100] sm:$0xff]  ;;  %v240_v34 = vld [vmem:[#allocation8 + $0x198] sm:$0xff] }
  0x50   :  { %925 = vmatpush3.bf16.msra.mxu1 %v924_v39  ;;  %v914_v22 = vpack.c.bf16 %v187_v15, %v181_v14  ;;  %v942_v25 = vpack.c.bf16 %v218_v17, %v217_v16  ;;  %v944_v28 = vpack.c.bf16 %v202_v21, %v201_v20  ;;  %v916_v29 = vpack.c.bf16 %v186_v24, %v180_v23  ;;  %v223_v37 = vld [vmem:[#allocation8 + $0x110] sm:$0xff]  ;;  %v241_v39 = vld [vmem:[#allocation8 + $0x1a0] sm:$0xff]  ;;  %v226_v43 = vld [vmem:[#allocation8 + $0x128] sm:$0xff] }
  0x51   :  { %158 = vst.msk [vmem:[#allocation2] sm:$0xff] %vm66_vm0, %v157_v38  ;;  %927 = vmatprep.subr.bf16.mxu1 %v926_v40  ;;  %v950_v30 = vpack.c.bf16 %v238_v27, %v237_v26  ;;  %v952_v35 = vpack.c.bf16 %v222_v32, %v221_v31  ;;  %v954_v36 = vpack.c.bf16 %v240_v34, %v239_v33  ;;  %v224_v38 = vld [vmem:[#allocation8 + $0x118] sm:$0xff]  ;;  %v242_v40 = vld [vmem:[#allocation8 + $0x1a8] sm:$0xff]  ;;  %v225_v42 = vld [vmem:[#allocation8 + $0x120] sm:$0xff]  ;;  %v287_v21 = vlaneseq }
  0x52   :  { %v958_v41 = vpack.c.bf16 %v242_v40, %v241_v39  ;;  %v243_v44 = vld [vmem:[#allocation8 + $0x1b0] sm:$0xff]  ;;  %v228_v49 = vld [vmem:[#allocation8 + $0x138] sm:$0xff]  ;;  %v245_v50 = vld [vmem:[#allocation8 + $0x1c0] sm:$0xff] }
  0x53   :  { %v227_v48 = vld [vmem:[#allocation8 + $0x130] sm:$0xff]  ;;  %v246_v51 = vld [vmem:[#allocation8 + $0x1c8] sm:$0xff]  ;;  %v229_v54 = vld [vmem:[#allocation8 + $0x140] sm:$0xff] }
  0x54   :  { %929 = vmatpush3.bf16.msra.mxu1 %v928_v45  ;;  %v244_v45 = vld [vmem:[#allocation8 + $0x1b8] sm:$0xff]  ;;  %v964_v52 = vpack.c.bf16 %v228_v49, %v227_v48  ;;  %v966_v53 = vpack.c.bf16 %v246_v51, %v245_v50  ;;  %v230_v55 = vld [vmem:[#allocation8 + $0x148] sm:$0xff]  ;;  %v247_v59 = vld [vmem:[#allocation8 + $0x1d0] sm:$0xff] }
  0x55   :  { %931 = vmatprep.subr.bf16.mxu1 %v930_v46  ;;  %v960_v46 = vpack.c.bf16 %v226_v43, %v225_v42  ;;  %v962_v47 = vpack.c.bf16 %v244_v45, %v243_v44  ;;  %v204_v63 = vld [vmem:[#allocation8 + $0x78] sm:$0xff]  ;;  %v231_v3 = vld [vmem:[#allocation8 + $0x150] sm:$0xff]  ;;  %v270_v10 = vld [vmem:[#allocation8 + $0x288] sm:$0xff] }
  0x56   :  { %v232_v4 = vld [vmem:[#allocation8 + $0x158] sm:$0xff]  ;;  %v234_v12 = vld [vmem:[#allocation8 + $0x168] sm:$0xff]  ;;  %v251_v15 = vld [vmem:[#allocation8 + $0x1f0] sm:$0xff] }
  0x57   :  { %v972_v5 = vpack.c.bf16 %v232_v4, %v231_v3  ;;  %v252_v16 = vld [vmem:[#allocation8 + $0x1f8] sm:$0xff]  ;;  %v253_v32 = vld [vmem:[#allocation8 + $0x200] sm:$0xff]  ;;  %v254_v33 = vld [vmem:[#allocation8 + $0x208] sm:$0xff] }
  0x58   :  { %v162_v57 = vld [vmem:[#allocation2] sm:$0xff]  ;;  %933 = vmatpush3.bf16.msra.mxu1 %v932_v56  ;;  %v968_v56 = vpack.c.bf16 %v230_v55, %v229_v54  ;;  %v978_v17 = vpack.c.bf16 %v252_v16, %v251_v15  ;;  %v984_v39 = vpack.c.bf16 %v254_v33, %v253_v32  ;;  %v255_v42 = vld [vmem:[#allocation8 + $0x210] sm:$0xff]  ;;  %v273_v45 = vld [vmem:[#allocation8 + $0x2a0] sm:$0xff] }
  0x59   :  { %v163_v61 = vmul.f32 0.125, %v162_v57  ;;  %935 = vmatprep.subr.bf16.mxu1 %v934_v1  ;;  %v219_v57 = vld [vmem:[#allocation8 + $0xf0] sm:$0xff]  ;;  %v1225_v24 = vld [vmem:[%s1256_s2] sm:$0x3f] }
  0x5a   :  { %v256_v43 = vld [vmem:[#allocation8 + $0x218] sm:$0xff]  ;;  %v275_v55 = vld [vmem:[#allocation8 + $0x2b0] sm:$0xff] }
  0x5b   :  { %784 = vmatmul.mubr.msk.f32.vlgmr.msra.gmra.mrb[0].mxu0 %vm66_vm0, %v163_v61  ;;  %v988_v48 = vpack.c.bf16 %v256_v43, %v255_v42  ;;  %v263_v16 = vld [vmem:[#allocation8 + $0x250] sm:$0xff] }
  0x5c   :  { %905 = vmatpush1.bf16.msra.mxu0 %v904_v58  ;;  %455 = vmatprep.mubr.f32.mxu0 %v1128_v0  ;;  %v220_v58 = vld [vmem:[#allocation8 + $0xf8] sm:$0xff]  ;;  %v267_v33 = vld [vmem:[#allocation8 + $0x270] sm:$0xff] }
  0x5d   :  { %907 = vmatprep.subr.bf16.mxu0 %v906_v62  ;;  %937 = vmatpush3.bf16.msra.mxu1 %v936_v6  ;;  %v946_v60 = vpack.c.bf16 %v220_v58, %v219_v57  ;;  %v203_v62 = vld [vmem:[#allocation8 + $0x70] sm:$0xff]  ;;  %v249_v6 = vld [vmem:[#allocation8 + $0x1e0] sm:$0xff] }
  0x5e   :  { %939 = vmatprep.subr.bf16.mxu1 %v938_v8  ;;  %v948_v2 = vpack.c.bf16 %v204_v63, %v203_v62  ;;  %v269_v8 = vld [vmem:[#allocation8 + $0x280] sm:$0xff]  ;;  %v259_v62 = vld [vmem:[#allocation8 + $0x230] sm:$0xff]  ;;  %v260_v63 = vld [vmem:[#allocation8 + $0x238] sm:$0xff] }
  0x5f   :  { %v982_v13 = vpack.c.bf16 %v270_v10, %v269_v8  ;;  %v996_v4 = vpack.c.bf16 %v260_v63, %v259_v62  ;;  %v262_v8 = vld [vmem:[#allocation8 + $0x248] sm:$0xff]  ;;  %v279_v10 = vld [vmem:[#allocation8 + $0x2d0] sm:$0xff] }
  0x60   :  { %909 = vmatpush1.bf16.msra.mxu0 %v908_v7  ;;  %v250_v7 = vld [vmem:[#allocation8 + $0x1e8] sm:$0xff] }
  0x61   :  { %911 = vmatprep.subr.bf16.mxu0 %v910_v11  ;;  %941 = vmatpush3.bf16.msra.mxu1 %v940_v18  ;;  %v974_v9 = vpack.c.bf16 %v250_v7, %v249_v6  ;;  %v233_v11 = vld [vmem:[#allocation8 + $0x160] sm:$0xff]  ;;  %v235_v18 = vld [vmem:[#allocation8 + $0x170] sm:$0xff] }
  0x62   :  { %943 = vmatprep.subr.bf16.mxu1 %v942_v25  ;;  %v976_v14 = vpack.c.bf16 %v234_v12, %v233_v11  ;;  %v261_v7 = vld [vmem:[#allocation8 + $0x240] sm:$0xff]  ;;  %v280_v11 = vld [vmem:[#allocation8 + $0x2d8] sm:$0xff] }
  0x63   :  { %785 = vmatmul.mubr.msk.f32.vlgmr.msra.gmra.mrb[2].mxu0 %vm66_vm0, %v163_v61  ;;  %v1002_v15 = vpack.c.bf16 %v280_v11, %v279_v10 }
  0x64   :  { %913 = vmatpush1.bf16.msra.mxu0 %v912_v19  ;;  %526 = vmatprep.mubr.f32.mxu0 %v1128_v0  ;;  %v956_v0 = vpack.c.bf16 %v224_v38, %v223_v37  ;;  %v236_v19 = vld [vmem:[#allocation8 + $0x178] sm:$0xff] }
  0x65   :  { %915 = vmatprep.subr.bf16.mxu0 %v914_v22  ;;  %945 = vmatpush3.bf16.msra.mxu1 %v944_v28  ;;  %v980_v20 = vpack.c.bf16 %v236_v19, %v235_v18  ;;  %v1219_v22 = vshrl.u32 %v287_v21, 7  ;;  %v272_v37 = vld [vmem:[#allocation8 + $0x298] sm:$0xff]  ;;  %v281_v18 = vld [vmem:[#allocation8 + $0x2e0] sm:$0xff]  ;;  %v282_v19 = vld [vmem:[#allocation8 + $0x2e8] sm:$0xff] }
  0x66   :  { %947 = vmatprep.subr.bf16.mxu1 %v946_v60 }
  0x67   :  { %v289_v23 = vsub.s32 0, %v1219_v22  ;;  %v293_v25 = vsub.s32 1, %v1219_v22  ;;  %v297_v31 = vsub.s32 2, %v1219_v22  ;;  %v309_v57 = vsub.s32 5, %v1219_v22 }
  0x68   :  { %917 = vmatpush1.bf16.msra.mxu0 %v916_v29 }
  0x69   :  { %951 = vmatprep.subr.bf16.mxu0 %v950_v30  ;;  %949 = vmatpush3.bf16.msra.mxu1 %v948_v2  ;;  %v290_v26 = vrot.slane %v1225_v24, %v289_v23  ;;  %v294_v27 = vrot.slane %v1225_v24, %v293_v25  ;;  %v278_v2 = vld [vmem:[#allocation8 + $0x2c8] sm:$0xff]  ;;  %v310_v3 = vrot.slane %v1225_v24, %v309_v57  ;;  %v305_v23 = vsub.s32 4, %v1219_v22 }
  0x6a   :  { %983 = vmatprep.subr.bf16.mxu1 %v982_v13  ;;  %v1000_v13 = vpack.c.bf16 %v262_v8, %v261_v7  ;;  %v1006_v25 = vpack.c.bf16 %v282_v19, %v281_v18 }
  0x6b   :  { %786 = vmatmul.mubr.msk.f32.vlgmr.msra.gmra.mrb[4].mxu0 %vm66_vm0, %v163_v61  ;;  %v248_v61 = vld [vmem:[#allocation8 + $0x1d8] sm:$0xff] }
  0x6c   :  { %953 = vmatpush3.bf16.msra.mxu0 %v952_v35  ;;  %v970_v1 = vpack.c.bf16 %v248_v61, %v247_v59  ;;  %v301_v35 = vsub.s32 3, %v1219_v22 }
  0x6d   :  { %955 = vmatprep.subr.bf16.mxu0 %v954_v36  ;;  %v271_v36 = vld [vmem:[#allocation8 + $0x290] sm:$0xff] }
  0x6e   :  { %v302_v44 = vrot.slane %v1225_v24, %v301_v35 }
  0x70   :  { %957 = vmatpush3.bf16.msra.mxu0 %v956_v0  ;;  %v298_v0 = vrot.slane %v1225_v24, %v297_v31  ;;  %v306_v31 = vrot.slane %v1225_v24, %v305_v23 }
  0x71   :  { %959 = vmatprep.subr.bf16.mxu0 %v958_v41  ;;  %v986_v41 = vpack.c.bf16 %v272_v37, %v271_v36 }
  0x74   :  { %961 = vmatpush3.bf16.msra.mxu0 %v960_v46  ;;  %v274_v46 = vld [vmem:[#allocation8 + $0x2a8] sm:$0xff] }
  0x75   :  { %963 = vmatprep.subr.bf16.mxu0 %v962_v47  ;;  %v990_v51 = vpack.c.bf16 %v274_v46, %v273_v45 }
  0x78   :  { %965 = vmatpush3.bf16.msra.mxu0 %v964_v52  ;;  %v257_v52 = vld [vmem:[#allocation8 + $0x220] sm:$0xff] }
  0x79   :  { %967 = vmatprep.subr.bf16.mxu0 %v966_v53  ;;  %v258_v53 = vld [vmem:[#allocation8 + $0x228] sm:$0xff] }
  0x7a   :  { %v992_v60 = vpack.c.bf16 %v258_v53, %v257_v52 }
  0x7c   :  { %969 = vmatpush3.bf16.msra.mxu0 %v968_v56  ;;  %v276_v56 = vld [vmem:[#allocation8 + $0x2b8] sm:$0xff] }
  0x7d   :  { %971 = vmatprep.subr.bf16.mxu0 %v970_v1  ;;  %v994_v61 = vpack.c.bf16 %v276_v56, %v275_v55  ;;  %v277_v1 = vld [vmem:[#allocation8 + $0x2c0] sm:$0xff] }
  0x7e   :  { %v998_v6 = vpack.c.bf16 %v278_v2, %v277_v1 }
  0x80   :  { %973 = vmatpush3.bf16.msra.mxu0 %v972_v5 }
  0x81   :  { %975 = vmatprep.subr.bf16.mxu0 %v974_v9 }
  0x84   :  { %977 = vmatpush3.bf16.msra.mxu0 %v976_v14 }
  0x85   :  { %979 = vmatprep.subr.bf16.mxu0 %v978_v17  ;;  %v264_v17 = vld [vmem:[#allocation8 + $0x258] sm:$0xff] }
  0x88   :  { %981 = vmatpush3.bf16.msra.mxu0 %v980_v20  ;;  %v1004_v20 = vpack.c.bf16 %v264_v17, %v263_v16 }
 0x12e   :  { %v386_v28 = vpop.f32.mrb[0].mxu0 }
 0x12f   :  { %v387_v29 = vadd.f32 %v386_v28, %v290_v26  ;;  %v388_v30 = vpop.f32.mrb[1].mxu0  ;;  %v265_v26 = vld [vmem:[#allocation8 + $0x260] sm:$0xff]  ;;  %v283_v28 = vld [vmem:[#allocation8 + $0x2f0] sm:$0xff] }
 0x130   :  { %v389_v34 = vadd.f32 %v388_v30, %v294_v27  ;;  %v266_v27 = vld [vmem:[#allocation8 + $0x268] sm:$0xff] }
 0x131   :  { %v533_v40 = vmax.f32 %v387_v29, 0.0  ;;  %v284_v29 = vld [vmem:[#allocation8 + $0x2f8] sm:$0xff]  ;;  %v1008_v30 = vpack.c.bf16 %v266_v27, %v265_v26 }
 0x132   :  { %v534_v38 = vmax.f32 %v389_v34, 0.0  ;;  %v1010_v32 = vpack.c.bf16 %v284_v29, %v283_v28  ;;  %v268_v34 = vld [vmem:[#allocation8 + $0x278] sm:$0xff] }
 0x133   :  { %v1012_v35 = vpack.c.bf16 %v268_v34, %v267_v33 }
 0x134   :  { %609 = vmatprep.mubr.f32.mxu1 %v534_v38 }
 0x135   :  { %610 = vmatmul.mubr.f32.vlgmr.msra.gmra.mrb[0].mxu1 %v533_v40  ;;  %v787_v40 = vld [vmem:[%s1258_s4] ss:$0 sm:$0xff]  ;;  %s774_s4 = sshll.u32 %s1129_s8, 4  ;;  %s775_s4 = int_to_ptr.vmem [resolvable:$true] %s774_s4 }
 0x136   :  { %v457_v47 = vpop.f32.mrb[2].mxu0  ;;  %985 = vmatpush3.bf16.msra.mxu1 %v984_v39  ;;  %s1093_s9 = scalar_lea.vmem %s775_s4, 128  ;;  %p1098_p11 = scmp.lt.s32.totalorder %s775_s4, %s775_s4 }
 0x137   :  { %v458_v49 = vadd.f32 %v457_v47, %v298_v0  ;;  %v459_v50 = vpop.f32.mrb[3].mxu0  ;;  %987 = vmatprep.subr.bf16.mxu1 %v986_v41  ;;  %p1094_p10 = scmp.ne.s32.totalorder %s775_s4, %s1093_s9  ;;  %p1099_p12 = scmp.lt.s32.totalorder %s1093_s9, %s1093_s9 }
 0x138   :  { %v460_v54 = vadd.f32 %v459_v50, %v302_v44 }
 0x139   :  { %v535_v58 = vmax.f32 %v458_v49, 0.0  ;;  %p1100_p13 = por %p1099_p12, %p1098_p11 }
 0x13a   :  { %v536_v59 = vmax.f32 %v460_v54, 0.0  ;;  %989 = vmatpush3.bf16.msra.mxu1 %v988_v48 }
 0x13b   :  { %991 = vmatprep.subr.bf16.mxu1 %v990_v51  ;;  %v756_v51 = vand.u32 127, %v287_v21  ;;  %p1101_p0 = pnand %p1100_p13, %p1094_p10 }
 0x13c   :  { %679 = vmatprep.mubr.f32.mxu0 %v536_v59 }
 0x13d   :  { %680 = vmatmul.mubr.f32.vlgmr.msra.gmra.mrb[6].mxu0 %v535_v58  ;;  %vm757_vm8 = vcmp.eq.s32.totalorder %v756_v51, 10  ;;  %vm758_vm9 = vcmp.eq.s32.totalorder %v756_v51, 11 }
 0x13e   :  { %993 = vmatpush3.bf16.msra.mxu1 %v992_v60  ;;  %v528_v5 = vpop.f32.mrb[4].mxu0  ;;  %vm759_vm10 = vmor %vm757_vm8, %vm758_vm9 }
 0x13f   :  { %995 = vmatprep.subr.bf16.mxu1 %v994_v61  ;;  %v530_v9 = vpop.f32.mrb[5].mxu0  ;;  %v529_v36 = vadd.f32 %v528_v5, %v306_v31 }
 0x140   :  { %v531_v12 = vadd.f32 %v530_v9, %v310_v3 }
 0x141   :  { %v537_v37 = vmax.f32 %v529_v36, 0.0 }
 0x142   :  { %997 = vmatpush3.bf16.msra.mxu1 %v996_v4  ;;  %v538_v14 = vmax.f32 %v531_v12, 0.0 }
 0x143   :  { %999 = vmatprep.subr.bf16.mxu1 %v998_v6 }
 0x144   :  { %749 = vmatprep.mubr.f32.mxu1 %v538_v14 }
 0x146   :  { %1001 = vmatpush3.bf16.msra.mxu1 %v1000_v13 }
 0x147   :  { %1003 = vmatprep.subr.bf16.mxu1 %v1002_v15 }
 0x14a   :  { %1005 = vmatpush3.bf16.msra.mxu1 %v1004_v20 }
 0x14b   :  { %1007 = vmatprep.subr.bf16.mxu1 %v1006_v25 }
 0x14e   :  { %1009 = vmatpush3.bf16.msra.mxu1 %v1008_v30 }
 0x14f   :  { %1011 = vmatprep.subr.bf16.mxu1 %v1010_v32 }
 0x152   :  { %1013 = vmatpush3.bf16.msra.mxu1 %v1012_v35 }
 0x155   :  { %750 = vmatmul.mubr.f32.vlgmr.msra.gmra.mrb[2].mxu1 %v537_v37 }
 0x208   :  { %v821_v22 = vpop.f32.mrb[0].mxu1 }
 0x209   :  { %v822_v38 = vpop.f32.mrb[1].mxu1 }
 0x20a   :  { %v823_v39 = vadd.f32 %v822_v38, %v821_v22 }
 0x20c   :  { %v612_v41 = vadd.f32 %v823_v39, %v787_v40 }
 0x210   :  { %v856_v0 = vpop.f32.mrb[6].mxu0 }
 0x211   :  { %v857_v24 = vpop.f32.mrb[7].mxu0 }
 0x212   :  { %v858_v42 = vadd.f32 %v857_v24, %v856_v0 }
 0x214   :  { %v682_v43 = vadd.f32 %v858_v42, %v612_v41 }
 0x228   :  { %v891_v44 = vpop.f32.mrb[2].mxu1 }
 0x229   :  { %v892_v45 = vpop.f32.mrb[3].mxu1 }
 0x22a   :  { %v893_v46 = vadd.f32 %v892_v45, %v891_v44 }
 0x22c   :  { %v752_v47 = vadd.f32 %v893_v46, %v682_v43 }
 0x22e   :  { %v788_v48 = vmul.f32 -1.442695, %v752_v47 }
 0x230   :  { %1023 = vpow2.f32 %v788_v48 }
 0x23a   :  { %v1024_v49 = vpop.eup %1023 }
 0x23b   :  { %v763_v50 = vadd.f32 1.0, %v1024_v49 }
 0x23d   :  { %1025 = vrcp.f32 %v763_v50 }
 0x247   :  { %v1026_v52 = vpop.eup %1025 }
 0x248   :  { %v766_v53 = vsel %vm759_vm10, %v1026_v52, %v752_v47 }
 0x249   :  { %767 = vst [vmem:[#allocation9] sm:$0xff] %v766_v53 }
 0x24a   :  { %1104 = shalt.err (!%p1101_p0)
}
 0x24b   :  { %s1105_s12 = scalar_lea.hbm %s1259_s5, 128 }
 0x24c   :  { %p1106_p1 = scmp.ne.s32.totalorder %s1259_s5, %s1105_s12  ;;  %p1109_p2 = scmp.lt.u32.totalorder %s1105_s12, %s1259_s5 }
 0x24e   :  { %p1111_p3 = pnand %p1109_p2, %p1106_p1 }
 0x250   :  { %1114 = shalt.err (!%p1111_p3)
}
 0x251   :  { %777 = dma.vmem_to_hbm [thread:$0]  %s775_s4, 128, %s1259_s5, [#allocation5]  }
 0x252   :  { %1119 = dma.done.wait [#allocation5], 128  }
 0x253   :  { %1120 = vsyncadd [#allocation5], 4294967168 }
 0x254   :  { %781 = vsyncpa [#allocation4], 1 }
 0x255   :  { %782 = vsyncpa [#allocation7], 1 }
 0x256   :  { %783 = vsyncpa [#allocation5], 1 }

</bundles_post_ra>
